<compile_context>
chip_gen: v7x
topology: tpu7x:2x2x1
jax: 0.10.0
libtpu: 0.0.40
codegen_flags: <defaults>
</compile_context>

<pallas_src>
import functools

import jax
import jax.numpy as jnp
import numpy as np
from jax import lax
from jax.experimental import pallas as pl
from jax.experimental.pallas import tpu as pltpu


# ----------------------------------------------------------------------------
# helpers
# ----------------------------------------------------------------------------
def _round_up(x: int, m: int) -> int:
    return ((x + m - 1) // m) * m


def _largest_divisor_leq(n: int, cap: int) -> int:
    cap = max(1, min(n, cap))
    for d in range(cap, 0, -1):
        if n % d == 0:
            return d
    return 1


def _sigmoid(x):
    # One EUP op (tanh) instead of exp + divide; mathematically identical.
    return 0.5 * jnp.tanh(0.5 * x) + 0.5


# ----------------------------------------------------------------------------
# Fused LSTM-layer kernel: per time-chunk input projection (MXU, per gate),
# serial recurrence over the chunk, optional fused FC head on the last layer.
# ----------------------------------------------------------------------------
def _lstm_layer_kernel(*refs, batch, chunk, head, unroll, compute_dtype):
    if head:
        (x_ref, h0_ref, c0_ref, b_ref, fcw_ref, fcb_ref, wih_hbm, whh_hbm,
         out_ref, hT_ref, cT_ref,
         h_scr, c_scr, wih_scr, whh_scr,
         pre_i_scr, pre_f_scr, pre_g_scr, pre_o_scr, ych_scr, sem) = refs
    else:
        (x_ref, h0_ref, c0_ref, b_ref, wih_hbm, whh_hbm,
         y_ref, hT_ref, cT_ref,
         h_scr, c_scr, wih_scr, whh_scr,
         pre_i_scr, pre_f_scr, pre_g_scr, pre_o_scr, sem) = refs

    B = batch
    ci = pl.program_id(0)
    pre_refs = (pre_i_scr, pre_f_scr, pre_g_scr, pre_o_scr)

    @pl.when(ci == 0)
    def _init():
        # One-time weight DMAs into single-buffered VMEM scratch.  Start them
        # first, overlap with the h/c init, wait just before first use.
        cp_ih = pltpu.make_async_copy(wih_hbm, wih_scr, sem.at[0])
        cp_hh = pltpu.make_async_copy(whh_hbm, whh_scr, sem.at[1])
        cp_ih.start()
        cp_hh.start()
        h_scr[...] = h0_ref[...].astype(jnp.float32)
        c_scr[...] = c0_ref[...].astype(jnp.float32)
        cp_ih.wait()
        cp_hh.wait()

    # ---- hoisted/fused input projection for the whole chunk (off the serial
    # path): one MXU matmul per gate -> lane-dense (chunk*B, H) f32 tiles.
    x2d = x_ref[...].astype(compute_dtype)
    for g in range(4):
        pre_refs[g][...] = (
            jnp.dot(x2d, wih_scr[g], preferred_element_type=jnp.float32)
            + b_ref[g])

    # ---- serial recurrence over the timesteps of this chunk -----------------
    def step(t, carry):
        h, c = carry
        h_cd = h.astype(compute_dtype)          # bf16 MXU operand, f32 accum
        row = pl.multiple_of(t * B, 8)          # B % 8 == 0 -> aligned slice
        # W_hh read from single-buffered VMEM scratch adjacent to each dot.
        gi = pre_i_scr[pl.ds(row, B), :] + jnp.dot(
            h_cd, whh_scr[0], preferred_element_type=jnp.float32)
        gf = pre_f_scr[pl.ds(row, B), :] + jnp.dot(
            h_cd, whh_scr[1], preferred_element_type=jnp.float32)
        gg = pre_g_scr[pl.ds(row, B), :] + jnp.dot(
            h_cd, whh_scr[2], preferred_element_type=jnp.float32)
        go = pre_o_scr[pl.ds(row, B), :] + jnp.dot(
            h_cd, whh_scr[3], preferred_element_type=jnp.float32)
        i_t = _sigmoid(gi)
        f_t = _sigmoid(gf)
        g_t = jnp.tanh(gg)
        o_t = _sigmoid(go)
        c_new = f_t * c + i_t * g_t
        h_new = o_t * jnp.tanh(c_new)
        if head:
            # Keep the hidden states in VMEM for the fused FC head.
            ych_scr[pl.ds(row, B), :] = h_new.astype(compute_dtype)
        else:
            y_ref[pl.ds(row, B), :] = h_new.astype(y_ref.dtype)
        return h_new, c_new

    h_fin, c_fin = lax.fori_loop(0, chunk, step, (h_scr[...], c_scr[...]),
                                 unroll=unroll)
    h_scr[...] = h_fin
    c_scr[...] = c_fin
    # Written every chunk (cheap B*H) instead of relying on last-chunk-only
    # writeback semantics for revisited output blocks.
    hT_ref[...] = h_fin.astype(hT_ref.dtype)
    cT_ref[...] = c_fin.astype(cT_ref.dtype)

    if head:
        # Fused FC head: the last layer's (T, B, H) activations never leave
        # VMEM; only (chunk*B, O) is stored to HBM.
        out = (jnp.dot(ych_scr[...], fcw_ref[...],
                       preferred_element_type=jnp.float32) + fcb_ref[...])
        out_ref[...] = out.astype(out_ref.dtype)


def lstm_layer(x2d, w_ih, w_hh, bias, h0, c0, *, seq_len, batch,
               fc_w=None, fc_b=None,
               compute_dtype=jnp.bfloat16, y_dtype=jnp.float32,
               out_dtype=jnp.float32, max_chunk=256,
               vmem_budget_bytes=28 << 20):
    """One LSTM layer (optionally fused with the FC head).

    x2d : (T*B, in_dim), time-major rows (row = t*B + b), B % 8 == 0.
    w_ih: (in_dim, 4H), w_hh: (H, 4H), bias: (1, 4H) -- PyTorch gate order.
    h0, c0: (B, H).
    Returns (y2d (T*B, H)  or  out2d (T*B, O) if fc_w given), h_T, c_T.
    """
    T, B = seq_len, batch
    NB, in_dim = x2d.shape
    assert NB == T * B and B % 8 == 0
    H = w_hh.shape[0]
    assert w_hh.shape[1] == 4 * H and w_ih.shape == (in_dim, 4 * H)
    head = fc_w is not None
    O = fc_w.shape[1] if head else 0

    # Per-gate, compute-dtype weights: every gate result is its own
    # lane-dense (.., H) tile (no mid-vreg gate slicing inside the kernel).
    wih_g = jnp.transpose(w_ih.reshape(in_dim, 4, H), (1, 0, 2)).astype(compute_dtype)
    whh_g = jnp.transpose(w_hh.reshape(H, 4, H), (1, 0, 2)).astype(compute_dtype)
    b_g = bias.reshape(4, 1, H).astype(jnp.float32)

    # ---- VMEM-budget-driven time-chunk length --------------------------------
    f32b = 4
    cdb = jnp.dtype(compute_dtype).itemsize
    xb = x2d.dtype.itemsize
    per_t = B * (2 * in_dim * xb + 4 * H * f32b)       # x block (2x) + pre scratch
    if head:
        per_t += B * (H * cdb + 2 * O * jnp.dtype(out_dtype).itemsize)
    else:
        per_t += B * 2 * H * jnp.dtype(y_dtype).itemsize
    fixed = (4 * in_dim * H * cdb + 4 * H * H * cdb    # single-buffered weights
             + 6 * B * H * f32b                        # h/c carry + h0/c0/hT/cT
             + 8 * H * f32b                            # bias block
             + (2 * (H * O + O) * f32b if head else 0)
             + (1 << 20))                              # slack
    if vmem_budget_bytes > fixed:
        cap = max(1, (vmem_budget_bytes - fixed) // per_t)
    else:
        cap = 1
    cap = min(cap, max_chunk)
    chunk = _largest_divisor_leq(T, cap)
    n_chunks = T // chunk
    unroll = _largest_divisor_leq(chunk, 8)            # partial unroll of recurrence
    vmem_limit = int(min(max(fixed + chunk * per_t + (8 << 20), 32 << 20),
                         100 << 20))

    # ---- specs ---------------------------------------------------------------
    in_specs = [
        pl.BlockSpec((chunk * B, in_dim), lambda c: (c, 0)),   # x rows (per chunk)
        pl.BlockSpec((B, H), lambda c: (0, 0)),                # h0
        pl.BlockSpec((B, H), lambda c: (0, 0)),                # c0
        pl.BlockSpec((4, 1, H), lambda c: (0, 0, 0)),          # per-gate bias
    ]
    operands = [x2d, h0, c0, b_g]
    if head:
        in_specs += [pl.BlockSpec((H, O), lambda c: (0, 0)),   # fc_w
                     pl.BlockSpec((1, O), lambda c: (0, 0))]   # fc_b
        operands += [fc_w.astype(compute_dtype), fc_b.astype(jnp.float32)]
    in_specs += [pl.BlockSpec(memory_space=pl.ANY),            # W_ih (HBM, manual DMA)
                 pl.BlockSpec(memory_space=pl.ANY)]            # W_hh (HBM, manual DMA)
    operands += [wih_g, whh_g]

    if head:
        out_shape = (jax.ShapeDtypeStruct((T * B, O), out_dtype),
                     jax.ShapeDtypeStruct((B, H), h0.dtype),
                     jax.ShapeDtypeStruct((B, H), c0.dtype))
        out_specs = [pl.BlockSpec((chunk * B, O), lambda c: (c, 0)),
                     pl.BlockSpec((B, H), lambda c: (0, 0)),
                     pl.BlockSpec((B, H), lambda c: (0, 0))]
    else:
        out_shape = (jax.ShapeDtypeStruct((T * B, H), y_dtype),
                     jax.ShapeDtypeStruct((B, H), h0.dtype),
                     jax.ShapeDtypeStruct((B, H), c0.dtype))
        out_specs = [pl.BlockSpec((chunk * B, H), lambda c: (c, 0)),
                     pl.BlockSpec((B, H), lambda c: (0, 0)),
                     pl.BlockSpec((B, H), lambda c: (0, 0))]

    scratch = [
        pltpu.VMEM((B, H), jnp.float32),                # h carry
        pltpu.VMEM((B, H), jnp.float32),                # c carry
        pltpu.VMEM((4, in_dim, H), compute_dtype),      # W_ih (single-buffered)
        pltpu.VMEM((4, H, H), compute_dtype),           # W_hh (single-buffered)
        pltpu.VMEM((chunk * B, H), jnp.float32),        # pre_i
        pltpu.VMEM((chunk * B, H), jnp.float32),        # pre_f
        pltpu.VMEM((chunk * B, H), jnp.float32),        # pre_g
        pltpu.VMEM((chunk * B, H), jnp.float32),        # pre_o
    ]
    if head:
        scratch.append(pltpu.VMEM((chunk * B, H), compute_dtype))  # y chunk for FC
    scratch.append(pltpu.SemaphoreType.DMA((2,)))

    kernel = functools.partial(
        _lstm_layer_kernel, batch=B, chunk=chunk, head=head, unroll=unroll,
        compute_dtype=compute_dtype)

    return pl.pallas_call(
        kernel,
        out_shape=out_shape,
        grid_spec=pltpu.PrefetchScalarGridSpec(
            num_scalar_prefetch=0,
            grid=(n_chunks,),
            in_specs=in_specs,
            out_specs=out_specs,
            scratch_shapes=scratch),
        compiler_params=pltpu.CompilerParams(
            dimension_semantics=("arbitrary",),
            vmem_limit_bytes=vmem_limit),
    )(*operands)


# ----------------------------------------------------------------------------
# AudioLSTM forward: x (B, T, input_dim), hs = (h0, c0) each (L, B, H).
# ----------------------------------------------------------------------------
def audio_lstm_forward(params, x, hs, *, compute_dtype=jnp.bfloat16,
                       max_chunk=256):
    h0s, c0s = hs
    B, T, in_dim = x.shape
    n_layers = len(params["lstm"])
    Bp = _round_up(B, 8)                       # pad batch -> aligned sublanes

    x_tm = jnp.transpose(x, (1, 0, 2))         # (T, B, in_dim) time-major
    if Bp != B:
        x_tm = jnp.pad(x_tm, ((0, 0), (0, Bp - B), (0, 0)))
    layer_in = x_tm.reshape(T * Bp, in_dim)    # 2D time-major rows

    io_dtype = jnp.bfloat16 if compute_dtype == jnp.bfloat16 else jnp.float32

    def pad_state(s):
        return jnp.pad(s, ((0, Bp - B), (0, 0))) if Bp != B else s

    h_fin, c_fin = [], []
    out2d = None
    for l, (w_ih, w_hh, bias) in enumerate(params["lstm"]):
        h0 = pad_state(h0s[l])
        c0 = pad_state(c0s[l])
        last = (l == n_layers - 1)
        if last:
            out2d, hT, cT = lstm_layer(
                layer_in, w_ih, w_hh, bias, h0, c0, seq_len=T, batch=Bp,
                fc_w=params["fc_w"], fc_b=params["fc_b"],
                compute_dtype=compute_dtype, out_dtype=x.dtype,
                max_chunk=max_chunk)
        else:
            layer_in, hT, cT = lstm_layer(
                layer_in, w_ih, w_hh, bias, h0, c0, seq_len=T, batch=Bp,
                compute_dtype=compute_dtype, y_dtype=io_dtype,
                max_chunk=max_chunk)
        h_fin.append(hT[:B])
        c_fin.append(cT[:B])

    O = params["fc_w"].shape[1]
    out = out2d.reshape(T, Bp, O)[:, :B, :].transpose(1, 0, 2)   # (B, T, O)
    return out, (jnp.stack(h_fin), jnp.stack(c_fin))


# ----------------------------------------------------------------------------
# Pure-JAX reference (lax.scan, all f32) for correctness checking.
# ----------------------------------------------------------------------------
def reference_forward(params, x, hs):
    h0s, c0s = hs
    x_tm = jnp.transpose(x, (1, 0, 2))
    H = params["lstm"][0][1].shape[0]

    def layer(x_seq, w_ih, w_hh, bias, h0, c0):
        def step(carry, x_t):
            h, c = carry
            gates = x_t @ w_ih + h @ w_hh + bias
            i = jax.nn.sigmoid(gates[:, 0 * H:1 * H])
            f = jax.nn.sigmoid(gates[:, 1 * H:2 * H])
            g = jnp.tanh(gates[:, 2 * H:3 * H])
            o = jax.nn.sigmoid(gates[:, 3 * H:4 * H])
            c_new = f * c + i * g
            h_new = o * jnp.tanh(c_new)
            return (h_new, c_new), h_new
        (hT, cT), ys = lax.scan(step, (h0, c0), x_seq)
        return ys, hT, cT

    h_fin, c_fin = [], []
    layer_in = x_tm
    for l, (w_ih, w_hh, bias) in enumerate(params["lstm"]):
        layer_in, hT, cT = layer(layer_in, w_ih, w_hh, bias, h0s[l], c0s[l])
        h_fin.append(hT)
        c_fin.append(cT)

    out = layer_in @ params["fc_w"] + params["fc_b"]
    return out.transpose(1, 0, 2), (jnp.stack(h_fin), jnp.stack(c_fin))


# ----------------------------------------------------------------------------
# Deterministic parameter init (PyTorch shapes; U(-1/sqrt(H), 1/sqrt(H))).
# ----------------------------------------------------------------------------
def init_params(key, input_dim, hidden_dim, output_dim, n_layers):
    k = 1.0 / np.sqrt(hidden_dim)
    params = {"lstm": []}
    for l in range(n_layers):
        in_dim = input_dim if l == 0 else hidden_dim
        key, k1, k2, k3, k4 = jax.random.split(key, 5)
        # PyTorch stores (4H, in); pre-transposed to (in, 4H), gate order ifgo.
        w_ih = jax.random.uniform(k1, (in_dim, 4 * hidden_dim), jnp.float32, -k, k)
        w_hh = jax.random.uniform(k2, (hidden_dim, 4 * hidden_dim), jnp.float32, -k, k)
        b_ih = jax.random.uniform(k3, (4 * hidden_dim,), jnp.float32, -k, k)
        b_hh = jax.random.uniform(k4, (4 * hidden_dim,), jnp.float32, -k, k)
        params["lstm"].append((w_ih, w_hh, (b_ih + b_hh)[None, :]))
    key, k1, k2 = jax.random.split(key, 3)
    params["fc_w"] = jax.random.uniform(k1, (hidden_dim, output_dim), jnp.float32, -k, k)
    params["fc_b"] = jax.random.uniform(k2, (1, output_dim), jnp.float32, -k, k)
    return params


if __name__ == "__main__":
    def run_case(B, T, input_dim, hidden_dim, output_dim, n_layers,
                 compute_dtype, max_chunk, rtol, atol, seed):
        key = jax.random.PRNGKey(seed)
        key, kx = jax.random.split(key)
        params = init_params(key, input_dim, hidden_dim, output_dim, n_layers)
        x = jax.random.normal(kx, (B, T, input_dim), jnp.float32)
        # init_hidden equivalent: zeros of shape (n_layers, B, hidden_dim).
        hs = (jnp.zeros((n_layers, B, hidden_dim), jnp.float32),
              jnp.zeros((n_layers, B, hidden_dim), jnp.float32))

        out, (hT, cT) = audio_lstm_forward(params, x, hs,
                                           compute_dtype=compute_dtype,
                                           max_chunk=max_chunk)
        out = jax.block_until_ready(out)
        hT = jax.block_until_ready(hT)
        cT = jax.block_until_ready(cT)

        ref_out, (ref_hT, ref_cT) = reference_forward(params, x, hs)
        np.testing.assert_allclose(out, ref_out, rtol=rtol, atol=atol)
        np.testing.assert_allclose(hT, ref_hT, rtol=rtol, atol=atol)
        np.testing.assert_allclose(cT, ref_cT, rtol=rtol, atol=atol)
        assert out.shape == (B, T, output_dim)
        assert hT.shape == (n_layers, B, hidden_dim)
        assert cT.shape == (n_layers, B, hidden_dim)

    # f32 everywhere, single time chunk.
    run_case(B=2, T=8, input_dim=16, hidden_dim=32, output_dim=8, n_layers=2,
             compute_dtype=jnp.float32, max_chunk=256,
             rtol=1e-4, atol=1e-4, seed=0)
    # bf16 MXU operands + bf16 inter-layer activations (f32 carry/accum),
    # multi-chunk recurrence (3 chunks of 4 steps); looser tolerance for bf16.
    run_case(B=3, T=12, input_dim=20, hidden_dim=48, output_dim=8, n_layers=2,
             compute_dtype=jnp.bfloat16, max_chunk=4,
             rtol=3e-2, atol=3e-2, seed=1)

    print("KERNEL_OK")
</pallas_src>

<mosaic_0001>
module attributes {stable_mosaic.version = 11 : i64} {
  func.func @_lstm_layer_kernel(%arg0: i32, %arg1: memref<64x16xf32, #tpu.memory_space<vmem>>, %arg2: memref<8x32xf32, #tpu.memory_space<vmem>>, %arg3: memref<8x32xf32, #tpu.memory_space<vmem>>, %arg4: memref<4x1x32xf32, #tpu.memory_space<vmem>>, %arg5: memref<4x16x32xf32, #tpu.memory_space<any>>, %arg6: memref<4x32x32xf32, #tpu.memory_space<any>>, %arg7: memref<64x32xf32, #tpu.memory_space<vmem>>, %arg8: memref<8x32xf32, #tpu.memory_space<vmem>>, %arg9: memref<8x32xf32, #tpu.memory_space<vmem>>, %arg10: memref<8x32xf32, #tpu.memory_space<vmem>>, %arg11: memref<8x32xf32, #tpu.memory_space<vmem>>, %arg12: memref<4x16x32xf32, #tpu.memory_space<vmem>>, %arg13: memref<4x32x32xf32, #tpu.memory_space<vmem>>, %arg14: memref<64x32xf32, #tpu.memory_space<vmem>>, %arg15: memref<64x32xf32, #tpu.memory_space<vmem>>, %arg16: memref<64x32xf32, #tpu.memory_space<vmem>>, %arg17: memref<64x32xf32, #tpu.memory_space<vmem>>, %arg18: memref<2x!tpu.dma_semaphore, #tpu.memory_space<semaphore_mem>>) attributes {dimension_semantics = [#tpu.dimension_semantics<arbitrary>], iteration_bounds = array<i64: 1>, scalar_prefetch = 0 : i64, scratch_operands = 9 : i64, tpu.core_type = #tpu.core_type<tc>, window_params = [{transform_indices = @transform_0, window_bounds = array<i64: 64, 16>}, {pipeline_mode = #tpu.pipeline_mode<synchronous>, transform_indices = @transform_1, window_bounds = array<i64: 8, 32>}, {pipeline_mode = #tpu.pipeline_mode<synchronous>, transform_indices = @transform_2, window_bounds = array<i64: 8, 32>}, {pipeline_mode = #tpu.pipeline_mode<synchronous>, transform_indices = @transform_3, window_bounds = array<i64: 4, 1, 32>}, {}, {}, {transform_indices = @transform_6, window_bounds = array<i64: 64, 32>}, {pipeline_mode = #tpu.pipeline_mode<synchronous>, transform_indices = @transform_7, window_bounds = array<i64: 8, 32>}, {pipeline_mode = #tpu.pipeline_mode<synchronous>, transform_indices = @transform_8, window_bounds = array<i64: 8, 32>}]} {
    %c0_i32 = arith.constant 0 : i32
    %0 = arith.cmpi eq, %arg0, %c0_i32 : i32
    %1 = arith.extui %0 : i1 to i32
    %c0_i32_0 = arith.constant 0 : i32
    %2 = arith.cmpi ne, %1, %c0_i32_0 : i32
    scf.if %2 {
      %c0_i32_295 = arith.constant 0 : i32
      %482 = tpu.memref_slice %arg18[%c0_i32_295] : memref<2x!tpu.dma_semaphore, #tpu.memory_space<semaphore_mem>> -> memref<1x!tpu.dma_semaphore, #tpu.memory_space<semaphore_mem>>
      %483 = tpu.memref_squeeze %482 : memref<1x!tpu.dma_semaphore, #tpu.memory_space<semaphore_mem>> -> memref<!tpu.dma_semaphore, #tpu.memory_space<semaphore_mem>>
      tpu.enqueue_dma source(%arg5 : memref<4x16x32xf32, #tpu.memory_space<any>>) target(%arg12 : memref<4x16x32xf32, #tpu.memory_space<vmem>>) target_semaphore(%483 : memref<!tpu.dma_semaphore, #tpu.memory_space<semaphore_mem>>)
      %c1_i32_296 = arith.constant 1 : i32
      %484 = tpu.memref_slice %arg18[%c1_i32_296] : memref<2x!tpu.dma_semaphore, #tpu.memory_space<semaphore_mem>> -> memref<1x!tpu.dma_semaphore, #tpu.memory_space<semaphore_mem>>
      %485 = tpu.memref_squeeze %484 : memref<1x!tpu.dma_semaphore, #tpu.memory_space<semaphore_mem>> -> memref<!tpu.dma_semaphore, #tpu.memory_space<semaphore_mem>>
      tpu.enqueue_dma source(%arg6 : memref<4x32x32xf32, #tpu.memory_space<any>>) target(%arg13 : memref<4x32x32xf32, #tpu.memory_space<vmem>>) target_semaphore(%485 : memref<!tpu.dma_semaphore, #tpu.memory_space<semaphore_mem>>)
      %c0_297 = arith.constant 0 : index
      %c0_298 = arith.constant 0 : index
      %486 = vector.load %arg2[%c0_297, %c0_298] : memref<8x32xf32, #tpu.memory_space<vmem>>, vector<8x32xf32>
      %c0_299 = arith.constant 0 : index
      %c0_300 = arith.constant 0 : index
      %487 = vector.load %arg10[%c0_299, %c0_300] : memref<8x32xf32, #tpu.memory_space<vmem>>, vector<8x32xf32>
      tpu.vector_store %arg10[%c0_299, %c0_300], %486 {strides = array<i32>} : memref<8x32xf32, #tpu.memory_space<vmem>>, vector<8x32xf32>,
      %c0_301 = arith.constant 0 : index
      %c0_302 = arith.constant 0 : index
      %488 = vector.load %arg3[%c0_301, %c0_302] : memref<8x32xf32, #tpu.memory_space<vmem>>, vector<8x32xf32>
      %c0_303 = arith.constant 0 : index
      %c0_304 = arith.constant 0 : index
      %489 = vector.load %arg11[%c0_303, %c0_304] : memref<8x32xf32, #tpu.memory_space<vmem>>, vector<8x32xf32>
      tpu.vector_store %arg11[%c0_303, %c0_304], %488 {strides = array<i32>} : memref<8x32xf32, #tpu.memory_space<vmem>>, vector<8x32xf32>,
      %c0_i32_305 = arith.constant 0 : i32
      %490 = tpu.memref_slice %arg18[%c0_i32_305] : memref<2x!tpu.dma_semaphore, #tpu.memory_space<semaphore_mem>> -> memref<1x!tpu.dma_semaphore, #tpu.memory_space<semaphore_mem>>
      %491 = tpu.memref_squeeze %490 : memref<1x!tpu.dma_semaphore, #tpu.memory_space<semaphore_mem>> -> memref<!tpu.dma_semaphore, #tpu.memory_space<semaphore_mem>>
      tpu.wait_dma2 semaphore(%491 : memref<!tpu.dma_semaphore, #tpu.memory_space<semaphore_mem>>) src(%arg5 : memref<4x16x32xf32, #tpu.memory_space<any>>) dst(%arg12 : memref<4x16x32xf32, #tpu.memory_space<vmem>>)
      %c1_i32_306 = arith.constant 1 : i32
      %492 = tpu.memref_slice %arg18[%c1_i32_306] : memref<2x!tpu.dma_semaphore, #tpu.memory_space<semaphore_mem>> -> memref<1x!tpu.dma_semaphore, #tpu.memory_space<semaphore_mem>>
      %493 = tpu.memref_squeeze %492 : memref<1x!tpu.dma_semaphore, #tpu.memory_space<semaphore_mem>> -> memref<!tpu.dma_semaphore, #tpu.memory_space<semaphore_mem>>
      tpu.wait_dma2 semaphore(%493 : memref<!tpu.dma_semaphore, #tpu.memory_space<semaphore_mem>>) src(%arg6 : memref<4x32x32xf32, #tpu.memory_space<any>>) dst(%arg13 : memref<4x32x32xf32, #tpu.memory_space<vmem>>)
    } else {
    }
    %c0 = arith.constant 0 : index
    %c0_1 = arith.constant 0 : index
    %3 = vector.load %arg1[%c0, %c0_1] : memref<64x16xf32, #tpu.memory_space<vmem>>, vector<64x16xf32>
    %c0_2 = arith.constant 0 : index
    %c0_3 = arith.constant 0 : index
    %c0_4 = arith.constant 0 : index
    %4 = vector.load %arg12[%c0_2, %c0_3, %c0_4] : memref<4x16x32xf32, #tpu.memory_space<vmem>>, vector<1x16x32xf32>
    %5 = vector.shape_cast %4 : vector<1x16x32xf32> to vector<16x32xf32>
    %cst = arith.constant dense<0.000000e+00> : vector<64x32xf32>
    %6 = tpu.matmul %3, %5, %cst {dimension_numbers = #tpu.dot_dimension_numbers<[1], [0], [0], [1], [0, 0, 1, 1], [], []>} : vector<64x16xf32>, vector<16x32xf32>, vector<64x32xf32> -> vector<64x32xf32>
    %c0_5 = arith.constant 0 : index
    %c0_6 = arith.constant 0 : index
    %c0_7 = arith.constant 0 : index
    %7 = vector.load %arg4[%c0_5, %c0_6, %c0_7] : memref<4x1x32xf32, #tpu.memory_space<vmem>>, vector<1x1x32xf32>
    %8 = vector.shape_cast %7 : vector<1x1x32xf32> to vector<1x32xf32>
    %9 = vector.broadcast %8 : vector<1x32xf32> to vector<64x32xf32>
    %10 = arith.addf %6, %9 : vector<64x32xf32>
    %c0_8 = arith.constant 0 : index
    %c0_9 = arith.constant 0 : index
    %11 = vector.load %arg14[%c0_8, %c0_9] : memref<64x32xf32, #tpu.memory_space<vmem>>, vector<64x32xf32>
    tpu.vector_store %arg14[%c0_8, %c0_9], %10 {strides = array<i32>} : memref<64x32xf32, #tpu.memory_space<vmem>>, vector<64x32xf32>,
    %c1 = arith.constant 1 : index
    %c0_10 = arith.constant 0 : index
    %c0_11 = arith.constant 0 : index
    %12 = vector.load %arg12[%c1, %c0_10, %c0_11] : memref<4x16x32xf32, #tpu.memory_space<vmem>>, vector<1x16x32xf32>
    %13 = vector.shape_cast %12 : vector<1x16x32xf32> to vector<16x32xf32>
    %cst_12 = arith.constant dense<0.000000e+00> : vector<64x32xf32>
    %14 = tpu.matmul %3, %13, %cst_12 {dimension_numbers = #tpu.dot_dimension_numbers<[1], [0], [0], [1], [0, 0, 1, 1], [], []>} : vector<64x16xf32>, vector<16x32xf32>, vector<64x32xf32> -> vector<64x32xf32>
    %c1_13 = arith.constant 1 : index
    %c0_14 = arith.constant 0 : index
    %c0_15 = arith.constant 0 : index
    %15 = vector.load %arg4[%c1_13, %c0_14, %c0_15] : memref<4x1x32xf32, #tpu.memory_space<vmem>>, vector<1x1x32xf32>
    %16 = vector.shape_cast %15 : vector<1x1x32xf32> to vector<1x32xf32>
    %17 = vector.broadcast %16 : vector<1x32xf32> to vector<64x32xf32>
    %18 = arith.addf %14, %17 : vector<64x32xf32>
    %c0_16 = arith.constant 0 : index
    %c0_17 = arith.constant 0 : index
    %19 = vector.load %arg15[%c0_16, %c0_17] : memref<64x32xf32, #tpu.memory_space<vmem>>, vector<64x32xf32>
    tpu.vector_store %arg15[%c0_16, %c0_17], %18 {strides = array<i32>} : memref<64x32xf32, #tpu.memory_space<vmem>>, vector<64x32xf32>,
    %c2 = arith.constant 2 : index
    %c0_18 = arith.constant 0 : index
    %c0_19 = arith.constant 0 : index
    %20 = vector.load %arg12[%c2, %c0_18, %c0_19] : memref<4x16x32xf32, #tpu.memory_space<vmem>>, vector<1x16x32xf32>
    %21 = vector.shape_cast %20 : vector<1x16x32xf32> to vector<16x32xf32>
    %cst_20 = arith.constant dense<0.000000e+00> : vector<64x32xf32>
    %22 = tpu.matmul %3, %21, %cst_20 {dimension_numbers = #tpu.dot_dimension_numbers<[1], [0], [0], [1], [0, 0, 1, 1], [], []>} : vector<64x16xf32>, vector<16x32xf32>, vector<64x32xf32> -> vector<64x32xf32>
    %c2_21 = arith.constant 2 : index
    %c0_22 = arith.constant 0 : index
    %c0_23 = arith.constant 0 : index
    %23 = vector.load %arg4[%c2_21, %c0_22, %c0_23] : memref<4x1x32xf32, #tpu.memory_space<vmem>>, vector<1x1x32xf32>
    %24 = vector.shape_cast %23 : vector<1x1x32xf32> to vector<1x32xf32>
    %25 = vector.broadcast %24 : vector<1x32xf32> to vector<64x32xf32>
    %26 = arith.addf %22, %25 : vector<64x32xf32>
    %c0_24 = arith.constant 0 : index
    %c0_25 = arith.constant 0 : index
    %27 = vector.load %arg16[%c0_24, %c0_25] : memref<64x32xf32, #tpu.memory_space<vmem>>, vector<64x32xf32>
    tpu.vector_store %arg16[%c0_24, %c0_25], %26 {strides = array<i32>} : memref<64x32xf32, #tpu.memory_space<vmem>>, vector<64x32xf32>,
    %c3 = arith.constant 3 : index
    %c0_26 = arith.constant 0 : index
    %c0_27 = arith.constant 0 : index
    %28 = vector.load %arg12[%c3, %c0_26, %c0_27] : memref<4x16x32xf32, #tpu.memory_space<vmem>>, vector<1x16x32xf32>
    %29 = vector.shape_cast %28 : vector<1x16x32xf32> to vector<16x32xf32>
    %cst_28 = arith.constant dense<0.000000e+00> : vector<64x32xf32>
    %30 = tpu.matmul %3, %29, %cst_28 {dimension_numbers = #tpu.dot_dimension_numbers<[1], [0], [0], [1], [0, 0, 1, 1], [], []>} : vector<64x16xf32>, vector<16x32xf32>, vector<64x32xf32> -> vector<64x32xf32>
    %c3_29 = arith.constant 3 : index
    %c0_30 = arith.constant 0 : index
    %c0_31 = arith.constant 0 : index
    %31 = vector.load %arg4[%c3_29, %c0_30, %c0_31] : memref<4x1x32xf32, #tpu.memory_space<vmem>>, vector<1x1x32xf32>
    %32 = vector.shape_cast %31 : vector<1x1x32xf32> to vector<1x32xf32>
    %33 = vector.broadcast %32 : vector<1x32xf32> to vector<64x32xf32>
    %34 = arith.addf %30, %33 : vector<64x32xf32>
    %c0_32 = arith.constant 0 : index
    %c0_33 = arith.constant 0 : index
    %35 = vector.load %arg17[%c0_32, %c0_33] : memref<64x32xf32, #tpu.memory_space<vmem>>, vector<64x32xf32>
    tpu.vector_store %arg17[%c0_32, %c0_33], %34 {strides = array<i32>} : memref<64x32xf32, #tpu.memory_space<vmem>>, vector<64x32xf32>,
    %c0_34 = arith.constant 0 : index
    %c0_35 = arith.constant 0 : index
    %36 = vector.load %arg10[%c0_34, %c0_35] : memref<8x32xf32, #tpu.memory_space<vmem>>, vector<8x32xf32>
    %c0_36 = arith.constant 0 : index
    %c0_37 = arith.constant 0 : index
    %37 = vector.load %arg11[%c0_36, %c0_37] : memref<8x32xf32, #tpu.memory_space<vmem>>, vector<8x32xf32>
    %c0_i32_38 = arith.constant 0 : i32
    %c8_i32 = arith.constant 8 : i32
    %38 = arith.muli %c0_i32_38, %c8_i32 : i32
    %39 = tpu.assume_multiple %38, 8 : i32
    %40 = arith.index_cast %39 : i32 to index
    %c0_39 = arith.constant 0 : index
    %41 = vector.load %arg14[%40, %c0_39] : memref<64x32xf32, #tpu.memory_space<vmem>>, vector<8x32xf32>
    %c0_40 = arith.constant 0 : index
    %c0_41 = arith.constant 0 : index
    %c0_42 = arith.constant 0 : index
    %42 = vector.load %arg13[%c0_40, %c0_41, %c0_42] : memref<4x32x32xf32, #tpu.memory_space<vmem>>, vector<1x32x32xf32>
    %43 = vector.shape_cast %42 : vector<1x32x32xf32> to vector<32x32xf32>
    %cst_43 = arith.constant dense<0.000000e+00> : vector<8x32xf32>
    %44 = tpu.matmul %36, %43, %cst_43 {dimension_numbers = #tpu.dot_dimension_numbers<[1], [0], [0], [1], [0, 0, 1, 1], [], []>} : vector<8x32xf32>, vector<32x32xf32>, vector<8x32xf32> -> vector<8x32xf32>
    %45 = arith.addf %41, %44 : vector<8x32xf32>
    %46 = arith.index_cast %39 : i32 to index
    %c0_44 = arith.constant 0 : index
    %47 = vector.load %arg15[%46, %c0_44] : memref<64x32xf32, #tpu.memory_space<vmem>>, vector<8x32xf32>
    %c1_45 = arith.constant 1 : index
    %c0_46 = arith.constant 0 : index
    %c0_47 = arith.constant 0 : index
    %48 = vector.load %arg13[%c1_45, %c0_46, %c0_47] : memref<4x32x32xf32, #tpu.memory_space<vmem>>, vector<1x32x32xf32>
    %49 = vector.shape_cast %48 : vector<1x32x32xf32> to vector<32x32xf32>
    %cst_48 = arith.constant dense<0.000000e+00> : vector<8x32xf32>
    %50 = tpu.matmul %36, %49, %cst_48 {dimension_numbers = #tpu.dot_dimension_numbers<[1], [0], [0], [1], [0, 0, 1, 1], [], []>} : vector<8x32xf32>, vector<32x32xf32>, vector<8x32xf32> -> vector<8x32xf32>
    %51 = arith.addf %47, %50 : vector<8x32xf32>
    %52 = arith.index_cast %39 : i32 to index
    %c0_49 = arith.constant 0 : index
    %53 = vector.load %arg16[%52, %c0_49] : memref<64x32xf32, #tpu.memory_space<vmem>>, vector<8x32xf32>
    %c2_50 = arith.constant 2 : index
    %c0_51 = arith.constant 0 : index
    %c0_52 = arith.constant 0 : index
    %54 = vector.load %arg13[%c2_50, %c0_51, %c0_52] : memref<4x32x32xf32, #tpu.memory_space<vmem>>, vector<1x32x32xf32>
    %55 = vector.shape_cast %54 : vector<1x32x32xf32> to vector<32x32xf32>
    %cst_53 = arith.constant dense<0.000000e+00> : vector<8x32xf32>
    %56 = tpu.matmul %36, %55, %cst_53 {dimension_numbers = #tpu.dot_dimension_numbers<[1], [0], [0], [1], [0, 0, 1, 1], [], []>} : vector<8x32xf32>, vector<32x32xf32>, vector<8x32xf32> -> vector<8x32xf32>
    %57 = arith.addf %53, %56 : vector<8x32xf32>
    %58 = arith.index_cast %39 : i32 to index
    %c0_54 = arith.constant 0 : index
    %59 = vector.load %arg17[%58, %c0_54] : memref<64x32xf32, #tpu.memory_space<vmem>>, vector<8x32xf32>
    %c3_55 = arith.constant 3 : index
    %c0_56 = arith.constant 0 : index
    %c0_57 = arith.constant 0 : index
    %60 = vector.load %arg13[%c3_55, %c0_56, %c0_57] : memref<4x32x32xf32, #tpu.memory_space<vmem>>, vector<1x32x32xf32>
    %61 = vector.shape_cast %60 : vector<1x32x32xf32> to vector<32x32xf32>
    %cst_58 = arith.constant dense<0.000000e+00> : vector<8x32xf32>
    %62 = tpu.matmul %36, %61, %cst_58 {dimension_numbers = #tpu.dot_dimension_numbers<[1], [0], [0], [1], [0, 0, 1, 1], [], []>} : vector<8x32xf32>, vector<32x32xf32>, vector<8x32xf32> -> vector<8x32xf32>
    %63 = arith.addf %59, %62 : vector<8x32xf32>
    %cst_59 = arith.constant 5.000000e-01 : f32
    %64 = vector.broadcast %cst_59 : f32 to vector<8x32xf32>
    %65 = arith.mulf %64, %45 : vector<8x32xf32>
    %66 = math.tanh %65 : vector<8x32xf32>
    %cst_60 = arith.constant 5.000000e-01 : f32
    %67 = vector.broadcast %cst_60 : f32 to vector<8x32xf32>
    %68 = arith.mulf %67, %66 : vector<8x32xf32>
    %cst_61 = arith.constant 5.000000e-01 : f32
    %69 = vector.broadcast %cst_61 : f32 to vector<8x32xf32>
    %70 = arith.addf %68, %69 : vector<8x32xf32>
    %cst_62 = arith.constant 5.000000e-01 : f32
    %71 = vector.broadcast %cst_62 : f32 to vector<8x32xf32>
    %72 = arith.mulf %71, %51 : vector<8x32xf32>
    %73 = math.tanh %72 : vector<8x32xf32>
    %cst_63 = arith.constant 5.000000e-01 : f32
    %74 = vector.broadcast %cst_63 : f32 to vector<8x32xf32>
    %75 = arith.mulf %74, %73 : vector<8x32xf32>
    %cst_64 = arith.constant 5.000000e-01 : f32
    %76 = vector.broadcast %cst_64 : f32 to vector<8x32xf32>
    %77 = arith.addf %75, %76 : vector<8x32xf32>
    %78 = math.tanh %57 : vector<8x32xf32>
    %cst_65 = arith.constant 5.000000e-01 : f32
    %79 = vector.broadcast %cst_65 : f32 to vector<8x32xf32>
    %80 = arith.mulf %79, %63 : vector<8x32xf32>
    %81 = math.tanh %80 : vector<8x32xf32>
    %cst_66 = arith.constant 5.000000e-01 : f32
    %82 = vector.broadcast %cst_66 : f32 to vector<8x32xf32>
    %83 = arith.mulf %82, %81 : vector<8x32xf32>
    %cst_67 = arith.constant 5.000000e-01 : f32
    %84 = vector.broadcast %cst_67 : f32 to vector<8x32xf32>
    %85 = arith.addf %83, %84 : vector<8x32xf32>
    %86 = arith.mulf %77, %37 : vector<8x32xf32>
    %87 = arith.mulf %70, %78 : vector<8x32xf32>
    %88 = arith.addf %86, %87 : vector<8x32xf32>
    %89 = math.tanh %88 : vector<8x32xf32>
    %90 = arith.mulf %85, %89 : vector<8x32xf32>
    %91 = arith.index_cast %39 : i32 to index
    %c0_68 = arith.constant 0 : index
    %92 = vector.load %arg7[%91, %c0_68] : memref<64x32xf32, #tpu.memory_space<vmem>>, vector<8x32xf32>
    tpu.vector_store %arg7[%91, %c0_68], %90 {strides = array<i32>} : memref<64x32xf32, #tpu.memory_space<vmem>>, vector<8x32xf32>,
    %c1_i32 = arith.constant 1 : i32
    %c8_i32_69 = arith.constant 8 : i32
    %93 = arith.muli %c1_i32, %c8_i32_69 : i32
    %94 = tpu.assume_multiple %93, 8 : i32
    %95 = arith.index_cast %94 : i32 to index
    %c0_70 = arith.constant 0 : index
    %96 = vector.load %arg14[%95, %c0_70] : memref<64x32xf32, #tpu.memory_space<vmem>>, vector<8x32xf32>
    %c0_71 = arith.constant 0 : index
    %c0_72 = arith.constant 0 : index
    %c0_73 = arith.constant 0 : index
    %97 = vector.load %arg13[%c0_71, %c0_72, %c0_73] : memref<4x32x32xf32, #tpu.memory_space<vmem>>, vector<1x32x32xf32>
    %98 = vector.shape_cast %97 : vector<1x32x32xf32> to vector<32x32xf32>
    %cst_74 = arith.constant dense<0.000000e+00> : vector<8x32xf32>
    %99 = tpu.matmul %90, %98, %cst_74 {dimension_numbers = #tpu.dot_dimension_numbers<[1], [0], [0], [1], [0, 0, 1, 1], [], []>} : vector<8x32xf32>, vector<32x32xf32>, vector<8x32xf32> -> vector<8x32xf32>
    %100 = arith.addf %96, %99 : vector<8x32xf32>
    %101 = arith.index_cast %94 : i32 to index
    %c0_75 = arith.constant 0 : index
    %102 = vector.load %arg15[%101, %c0_75] : memref<64x32xf32, #tpu.memory_space<vmem>>, vector<8x32xf32>
    %c1_76 = arith.constant 1 : index
    %c0_77 = arith.constant 0 : index
    %c0_78 = arith.constant 0 : index
    %103 = vector.load %arg13[%c1_76, %c0_77, %c0_78] : memref<4x32x32xf32, #tpu.memory_space<vmem>>, vector<1x32x32xf32>
    %104 = vector.shape_cast %103 : vector<1x32x32xf32> to vector<32x32xf32>
    %cst_79 = arith.constant dense<0.000000e+00> : vector<8x32xf32>
    %105 = tpu.matmul %90, %104, %cst_79 {dimension_numbers = #tpu.dot_dimension_numbers<[1], [0], [0], [1], [0, 0, 1, 1], [], []>} : vector<8x32xf32>, vector<32x32xf32>, vector<8x32xf32> -> vector<8x32xf32>
    %106 = arith.addf %102, %105 : vector<8x32xf32>
    %107 = arith.index_cast %94 : i32 to index
    %c0_80 = arith.constant 0 : index
    %108 = vector.load %arg16[%107, %c0_80] : memref<64x32xf32, #tpu.memory_space<vmem>>, vector<8x32xf32>
    %c2_81 = arith.constant 2 : index
    %c0_82 = arith.constant 0 : index
    %c0_83 = arith.constant 0 : index
    %109 = vector.load %arg13[%c2_81, %c0_82, %c0_83] : memref<4x32x32xf32, #tpu.memory_space<vmem>>, vector<1x32x32xf32>
    %110 = vector.shape_cast %109 : vector<1x32x32xf32> to vector<32x32xf32>
    %cst_84 = arith.constant dense<0.000000e+00> : vector<8x32xf32>
    %111 = tpu.matmul %90, %110, %cst_84 {dimension_numbers = #tpu.dot_dimension_numbers<[1], [0], [0], [1], [0, 0, 1, 1], [], []>} : vector<8x32xf32>, vector<32x32xf32>, vector<8x32xf32> -> vector<8x32xf32>
    %112 = arith.addf %108, %111 : vector<8x32xf32>
    %113 = arith.index_cast %94 : i32 to index
    %c0_85 = arith.constant 0 : index
    %114 = vector.load %arg17[%113, %c0_85] : memref<64x32xf32, #tpu.memory_space<vmem>>, vector<8x32xf32>
    %c3_86 = arith.constant 3 : index
    %c0_87 = arith.constant 0 : index
    %c0_88 = arith.constant 0 : index
    %115 = vector.load %arg13[%c3_86, %c0_87, %c0_88] : memref<4x32x32xf32, #tpu.memory_space<vmem>>, vector<1x32x32xf32>
    %116 = vector.shape_cast %115 : vector<1x32x32xf32> to vector<32x32xf32>
    %cst_89 = arith.constant dense<0.000000e+00> : vector<8x32xf32>
    %117 = tpu.matmul %90, %116, %cst_89 {dimension_numbers = #tpu.dot_dimension_numbers<[1], [0], [0], [1], [0, 0, 1, 1], [], []>} : vector<8x32xf32>, vector<32x32xf32>, vector<8x32xf32> -> vector<8x32xf32>
    %118 = arith.addf %114, %117 : vector<8x32xf32>
    %cst_90 = arith.constant 5.000000e-01 : f32
    %119 = vector.broadcast %cst_90 : f32 to vector<8x32xf32>
    %120 = arith.mulf %119, %100 : vector<8x32xf32>
    %121 = math.tanh %120 : vector<8x32xf32>
    %cst_91 = arith.constant 5.000000e-01 : f32
    %122 = vector.broadcast %cst_91 : f32 to vector<8x32xf32>
    %123 = arith.mulf %122, %121 : vector<8x32xf32>
    %cst_92 = arith.constant 5.000000e-01 : f32
    %124 = vector.broadcast %cst_92 : f32 to vector<8x32xf32>
    %125 = arith.addf %123, %124 : vector<8x32xf32>
    %cst_93 = arith.constant 5.000000e-01 : f32
    %126 = vector.broadcast %cst_93 : f32 to vector<8x32xf32>
    %127 = arith.mulf %126, %106 : vector<8x32xf32>
    %128 = math.tanh %127 : vector<8x32xf32>
    %cst_94 = arith.constant 5.000000e-01 : f32
    %129 = vector.broadcast %cst_94 : f32 to vector<8x32xf32>
    %130 = arith.mulf %129, %128 : vector<8x32xf32>
    %cst_95 = arith.constant 5.000000e-01 : f32
    %131 = vector.broadcast %cst_95 : f32 to vector<8x32xf32>
    %132 = arith.addf %130, %131 : vector<8x32xf32>
    %133 = math.tanh %112 : vector<8x32xf32>
    %cst_96 = arith.constant 5.000000e-01 : f32
    %134 = vector.broadcast %cst_96 : f32 to vector<8x32xf32>
    %135 = arith.mulf %134, %118 : vector<8x32xf32>
    %136 = math.tanh %135 : vector<8x32xf32>
    %cst_97 = arith.constant 5.000000e-01 : f32
    %137 = vector.broadcast %cst_97 : f32 to vector<8x32xf32>
    %138 = arith.mulf %137, %136 : vector<8x32xf32>
    %cst_98 = arith.constant 5.000000e-01 : f32
    %139 = vector.broadcast %cst_98 : f32 to vector<8x32xf32>
    %140 = arith.addf %138, %139 : vector<8x32xf32>
    %141 = arith.mulf %132, %88 : vector<8x32xf32>
    %142 = arith.mulf %125, %133 : vector<8x32xf32>
    %143 = arith.addf %141, %142 : vector<8x32xf32>
    %144 = math.tanh %143 : vector<8x32xf32>
    %145 = arith.mulf %140, %144 : vector<8x32xf32>
    %146 = arith.index_cast %94 : i32 to index
    %c0_99 = arith.constant 0 : index
    %147 = vector.load %arg7[%146, %c0_99] : memref<64x32xf32, #tpu.memory_space<vmem>>, vector<8x32xf32>
    tpu.vector_store %arg7[%146, %c0_99], %145 {strides = array<i32>} : memref<64x32xf32, #tpu.memory_space<vmem>>, vector<8x32xf32>,
    %c2_i32 = arith.constant 2 : i32
    %c8_i32_100 = arith.constant 8 : i32
    %148 = arith.muli %c2_i32, %c8_i32_100 : i32
    %149 = tpu.assume_multiple %148, 8 : i32
    %150 = arith.index_cast %149 : i32 to index
    %c0_101 = arith.constant 0 : index
    %151 = vector.load %arg14[%150, %c0_101] : memref<64x32xf32, #tpu.memory_space<vmem>>, vector<8x32xf32>
    %c0_102 = arith.constant 0 : index
    %c0_103 = arith.constant 0 : index
    %c0_104 = arith.constant 0 : index
    %152 = vector.load %arg13[%c0_102, %c0_103, %c0_104] : memref<4x32x32xf32, #tpu.memory_space<vmem>>, vector<1x32x32xf32>
    %153 = vector.shape_cast %152 : vector<1x32x32xf32> to vector<32x32xf32>
    %cst_105 = arith.constant dense<0.000000e+00> : vector<8x32xf32>
    %154 = tpu.matmul %145, %153, %cst_105 {dimension_numbers = #tpu.dot_dimension_numbers<[1], [0], [0], [1], [0, 0, 1, 1], [], []>} : vector<8x32xf32>, vector<32x32xf32>, vector<8x32xf32> -> vector<8x32xf32>
    %155 = arith.addf %151, %154 : vector<8x32xf32>
    %156 = arith.index_cast %149 : i32 to index
    %c0_106 = arith.constant 0 : index
    %157 = vector.load %arg15[%156, %c0_106] : memref<64x32xf32, #tpu.memory_space<vmem>>, vector<8x32xf32>
    %c1_107 = arith.constant 1 : index
    %c0_108 = arith.constant 0 : index
    %c0_109 = arith.constant 0 : index
    %158 = vector.load %arg13[%c1_107, %c0_108, %c0_109] : memref<4x32x32xf32, #tpu.memory_space<vmem>>, vector<1x32x32xf32>
    %159 = vector.shape_cast %158 : vector<1x32x32xf32> to vector<32x32xf32>
    %cst_110 = arith.constant dense<0.000000e+00> : vector<8x32xf32>
    %160 = tpu.matmul %145, %159, %cst_110 {dimension_numbers = #tpu.dot_dimension_numbers<[1], [0], [0], [1], [0, 0, 1, 1], [], []>} : vector<8x32xf32>, vector<32x32xf32>, vector<8x32xf32> -> vector<8x32xf32>
    %161 = arith.addf %157, %160 : vector<8x32xf32>
    %162 = arith.index_cast %149 : i32 to index
    %c0_111 = arith.constant 0 : index
    %163 = vector.load %arg16[%162, %c0_111] : memref<64x32xf32, #tpu.memory_space<vmem>>, vector<8x32xf32>
    %c2_112 = arith.constant 2 : index
    %c0_113 = arith.constant 0 : index
    %c0_114 = arith.constant 0 : index
    %164 = vector.load %arg13[%c2_112, %c0_113, %c0_114] : memref<4x32x32xf32, #tpu.memory_space<vmem>>, vector<1x32x32xf32>
    %165 = vector.shape_cast %164 : vector<1x32x32xf32> to vector<32x32xf32>
    %cst_115 = arith.constant dense<0.000000e+00> : vector<8x32xf32>
    %166 = tpu.matmul %145, %165, %cst_115 {dimension_numbers = #tpu.dot_dimension_numbers<[1], [0], [0], [1], [0, 0, 1, 1], [], []>} : vector<8x32xf32>, vector<32x32xf32>, vector<8x32xf32> -> vector<8x32xf32>
    %167 = arith.addf %163, %166 : vector<8x32xf32>
    %168 = arith.index_cast %149 : i32 to index
    %c0_116 = arith.constant 0 : index
    %169 = vector.load %arg17[%168, %c0_116] : memref<64x32xf32, #tpu.memory_space<vmem>>, vector<8x32xf32>
    %c3_117 = arith.constant 3 : index
    %c0_118 = arith.constant 0 : index
    %c0_119 = arith.constant 0 : index
    %170 = vector.load %arg13[%c3_117, %c0_118, %c0_119] : memref<4x32x32xf32, #tpu.memory_space<vmem>>, vector<1x32x32xf32>
    %171 = vector.shape_cast %170 : vector<1x32x32xf32> to vector<32x32xf32>
    %cst_120 = arith.constant dense<0.000000e+00> : vector<8x32xf32>
    %172 = tpu.matmul %145, %171, %cst_120 {dimension_numbers = #tpu.dot_dimension_numbers<[1], [0], [0], [1], [0, 0, 1, 1], [], []>} : vector<8x32xf32>, vector<32x32xf32>, vector<8x32xf32> -> vector<8x32xf32>
    %173 = arith.addf %169, %172 : vector<8x32xf32>
    %cst_121 = arith.constant 5.000000e-01 : f32
    %174 = vector.broadcast %cst_121 : f32 to vector<8x32xf32>
    %175 = arith.mulf %174, %155 : vector<8x32xf32>
    %176 = math.tanh %175 : vector<8x32xf32>
    %cst_122 = arith.constant 5.000000e-01 : f32
    %177 = vector.broadcast %cst_122 : f32 to vector<8x32xf32>
    %178 = arith.mulf %177, %176 : vector<8x32xf32>
    %cst_123 = arith.constant 5.000000e-01 : f32
    %179 = vector.broadcast %cst_123 : f32 to vector<8x32xf32>
    %180 = arith.addf %178, %179 : vector<8x32xf32>
    %cst_124 = arith.constant 5.000000e-01 : f32
    %181 = vector.broadcast %cst_124 : f32 to vector<8x32xf32>
    %182 = arith.mulf %181, %161 : vector<8x32xf32>
    %183 = math.tanh %182 : vector<8x32xf32>
    %cst_125 = arith.constant 5.000000e-01 : f32
    %184 = vector.broadcast %cst_125 : f32 to vector<8x32xf32>
    %185 = arith.mulf %184, %183 : vector<8x32xf32>
    %cst_126 = arith.constant 5.000000e-01 : f32
    %186 = vector.broadcast %cst_126 : f32 to vector<8x32xf32>
    %187 = arith.addf %185, %186 : vector<8x32xf32>
    %188 = math.tanh %167 : vector<8x32xf32>
    %cst_127 = arith.constant 5.000000e-01 : f32
    %189 = vector.broadcast %cst_127 : f32 to vector<8x32xf32>
    %190 = arith.mulf %189, %173 : vector<8x32xf32>
    %191 = math.tanh %190 : vector<8x32xf32>
    %cst_128 = arith.constant 5.000000e-01 : f32
    %192 = vector.broadcast %cst_128 : f32 to vector<8x32xf32>
    %193 = arith.mulf %192, %191 : vector<8x32xf32>
    %cst_129 = arith.constant 5.000000e-01 : f32
    %194 = vector.broadcast %cst_129 : f32 to vector<8x32xf32>
    %195 = arith.addf %193, %194 : vector<8x32xf32>
    %196 = arith.mulf %187, %143 : vector<8x32xf32>
    %197 = arith.mulf %180, %188 : vector<8x32xf32>
    %198 = arith.addf %196, %197 : vector<8x32xf32>
    %199 = math.tanh %198 : vector<8x32xf32>
    %200 = arith.mulf %195, %199 : vector<8x32xf32>
    %201 = arith.index_cast %149 : i32 to index
    %c0_130 = arith.constant 0 : index
    %202 = vector.load %arg7[%201, %c0_130] : memref<64x32xf32, #tpu.memory_space<vmem>>, vector<8x32xf32>
    tpu.vector_store %arg7[%201, %c0_130], %200 {strides = array<i32>} : memref<64x32xf32, #tpu.memory_space<vmem>>, vector<8x32xf32>,
    %c3_i32 = arith.constant 3 : i32
    %c8_i32_131 = arith.constant 8 : i32
    %203 = arith.muli %c3_i32, %c8_i32_131 : i32
    %204 = tpu.assume_multiple %203, 8 : i32
    %205 = arith.index_cast %204 : i32 to index
    %c0_132 = arith.constant 0 : index
    %206 = vector.load %arg14[%205, %c0_132] : memref<64x32xf32, #tpu.memory_space<vmem>>, vector<8x32xf32>
    %c0_133 = arith.constant 0 : index
    %c0_134 = arith.constant 0 : index
    %c0_135 = arith.constant 0 : index
    %207 = vector.load %arg13[%c0_133, %c0_134, %c0_135] : memref<4x32x32xf32, #tpu.memory_space<vmem>>, vector<1x32x32xf32>
    %208 = vector.shape_cast %207 : vector<1x32x32xf32> to vector<32x32xf32>
    %cst_136 = arith.constant dense<0.000000e+00> : vector<8x32xf32>
    %209 = tpu.matmul %200, %208, %cst_136 {dimension_numbers = #tpu.dot_dimension_numbers<[1], [0], [0], [1], [0, 0, 1, 1], [], []>} : vector<8x32xf32>, vector<32x32xf32>, vector<8x32xf32> -> vector<8x32xf32>
    %210 = arith.addf %206, %209 : vector<8x32xf32>
    %211 = arith.index_cast %204 : i32 to index
    %c0_137 = arith.constant 0 : index
    %212 = vector.load %arg15[%211, %c0_137] : memref<64x32xf32, #tpu.memory_space<vmem>>, vector<8x32xf32>
    %c1_138 = arith.constant 1 : index
    %c0_139 = arith.constant 0 : index
    %c0_140 = arith.constant 0 : index
    %213 = vector.load %arg13[%c1_138, %c0_139, %c0_140] : memref<4x32x32xf32, #tpu.memory_space<vmem>>, vector<1x32x32xf32>
    %214 = vector.shape_cast %213 : vector<1x32x32xf32> to vector<32x32xf32>
    %cst_141 = arith.constant dense<0.000000e+00> : vector<8x32xf32>
    %215 = tpu.matmul %200, %214, %cst_141 {dimension_numbers = #tpu.dot_dimension_numbers<[1], [0], [0], [1], [0, 0, 1, 1], [], []>} : vector<8x32xf32>, vector<32x32xf32>, vector<8x32xf32> -> vector<8x32xf32>
    %216 = arith.addf %212, %215 : vector<8x32xf32>
    %217 = arith.index_cast %204 : i32 to index
    %c0_142 = arith.constant 0 : index
    %218 = vector.load %arg16[%217, %c0_142] : memref<64x32xf32, #tpu.memory_space<vmem>>, vector<8x32xf32>
    %c2_143 = arith.constant 2 : index
    %c0_144 = arith.constant 0 : index
    %c0_145 = arith.constant 0 : index
    %219 = vector.load %arg13[%c2_143, %c0_144, %c0_145] : memref<4x32x32xf32, #tpu.memory_space<vmem>>, vector<1x32x32xf32>
    %220 = vector.shape_cast %219 : vector<1x32x32xf32> to vector<32x32xf32>
    %cst_146 = arith.constant dense<0.000000e+00> : vector<8x32xf32>
    %221 = tpu.matmul %200, %220, %cst_146 {dimension_numbers = #tpu.dot_dimension_numbers<[1], [0], [0], [1], [0, 0, 1, 1], [], []>} : vector<8x32xf32>, vector<32x32xf32>, vector<8x32xf32> -> vector<8x32xf32>
    %222 = arith.addf %218, %221 : vector<8x32xf32>
    %223 = arith.index_cast %204 : i32 to index
    %c0_147 = arith.constant 0 : index
    %224 = vector.load %arg17[%223, %c0_147] : memref<64x32xf32, #tpu.memory_space<vmem>>, vector<8x32xf32>
    %c3_148 = arith.constant 3 : index
    %c0_149 = arith.constant 0 : index
    %c0_150 = arith.constant 0 : index
    %225 = vector.load %arg13[%c3_148, %c0_149, %c0_150] : memref<4x32x32xf32, #tpu.memory_space<vmem>>, vector<1x32x32xf32>
    %226 = vector.shape_cast %225 : vector<1x32x32xf32> to vector<32x32xf32>
    %cst_151 = arith.constant dense<0.000000e+00> : vector<8x32xf32>
    %227 = tpu.matmul %200, %226, %cst_151 {dimension_numbers = #tpu.dot_dimension_numbers<[1], [0], [0], [1], [0, 0, 1, 1], [], []>} : vector<8x32xf32>, vector<32x32xf32>, vector<8x32xf32> -> vector<8x32xf32>
    %228 = arith.addf %224, %227 : vector<8x32xf32>
    %cst_152 = arith.constant 5.000000e-01 : f32
    %229 = vector.broadcast %cst_152 : f32 to vector<8x32xf32>
    %230 = arith.mulf %229, %210 : vector<8x32xf32>
    %231 = math.tanh %230 : vector<8x32xf32>
    %cst_153 = arith.constant 5.000000e-01 : f32
    %232 = vector.broadcast %cst_153 : f32 to vector<8x32xf32>
    %233 = arith.mulf %232, %231 : vector<8x32xf32>
    %cst_154 = arith.constant 5.000000e-01 : f32
    %234 = vector.broadcast %cst_154 : f32 to vector<8x32xf32>
    %235 = arith.addf %233, %234 : vector<8x32xf32>
    %cst_155 = arith.constant 5.000000e-01 : f32
    %236 = vector.broadcast %cst_155 : f32 to vector<8x32xf32>
    %237 = arith.mulf %236, %216 : vector<8x32xf32>
    %238 = math.tanh %237 : vector<8x32xf32>
    %cst_156 = arith.constant 5.000000e-01 : f32
    %239 = vector.broadcast %cst_156 : f32 to vector<8x32xf32>
    %240 = arith.mulf %239, %238 : vector<8x32xf32>
    %cst_157 = arith.constant 5.000000e-01 : f32
    %241 = vector.broadcast %cst_157 : f32 to vector<8x32xf32>
    %242 = arith.addf %240, %241 : vector<8x32xf32>
    %243 = math.tanh %222 : vector<8x32xf32>
    %cst_158 = arith.constant 5.000000e-01 : f32
    %244 = vector.broadcast %cst_158 : f32 to vector<8x32xf32>
    %245 = arith.mulf %244, %228 : vector<8x32xf32>
    %246 = math.tanh %245 : vector<8x32xf32>
    %cst_159 = arith.constant 5.000000e-01 : f32
    %247 = vector.broadcast %cst_159 : f32 to vector<8x32xf32>
    %248 = arith.mulf %247, %246 : vector<8x32xf32>
    %cst_160 = arith.constant 5.000000e-01 : f32
    %249 = vector.broadcast %cst_160 : f32 to vector<8x32xf32>
    %250 = arith.addf %248, %249 : vector<8x32xf32>
    %251 = arith.mulf %242, %198 : vector<8x32xf32>
    %252 = arith.mulf %235, %243 : vector<8x32xf32>
    %253 = arith.addf %251, %252 : vector<8x32xf32>
    %254 = math.tanh %253 : vector<8x32xf32>
    %255 = arith.mulf %250, %254 : vector<8x32xf32>
    %256 = arith.index_cast %204 : i32 to index
    %c0_161 = arith.constant 0 : index
    %257 = vector.load %arg7[%256, %c0_161] : memref<64x32xf32, #tpu.memory_space<vmem>>, vector<8x32xf32>
    tpu.vector_store %arg7[%256, %c0_161], %255 {strides = array<i32>} : memref<64x32xf32, #tpu.memory_space<vmem>>, vector<8x32xf32>,
    %c4_i32 = arith.constant 4 : i32
    %c8_i32_162 = arith.constant 8 : i32
    %258 = arith.muli %c4_i32, %c8_i32_162 : i32
    %259 = tpu.assume_multiple %258, 8 : i32
    %260 = arith.index_cast %259 : i32 to index
    %c0_163 = arith.constant 0 : index
    %261 = vector.load %arg14[%260, %c0_163] : memref<64x32xf32, #tpu.memory_space<vmem>>, vector<8x32xf32>
    %c0_164 = arith.constant 0 : index
    %c0_165 = arith.constant 0 : index
    %c0_166 = arith.constant 0 : index
    %262 = vector.load %arg13[%c0_164, %c0_165, %c0_166] : memref<4x32x32xf32, #tpu.memory_space<vmem>>, vector<1x32x32xf32>
    %263 = vector.shape_cast %262 : vector<1x32x32xf32> to vector<32x32xf32>
    %cst_167 = arith.constant dense<0.000000e+00> : vector<8x32xf32>
    %264 = tpu.matmul %255, %263, %cst_167 {dimension_numbers = #tpu.dot_dimension_numbers<[1], [0], [0], [1], [0, 0, 1, 1], [], []>} : vector<8x32xf32>, vector<32x32xf32>, vector<8x32xf32> -> vector<8x32xf32>
    %265 = arith.addf %261, %264 : vector<8x32xf32>
    %266 = arith.index_cast %259 : i32 to index
    %c0_168 = arith.constant 0 : index
    %267 = vector.load %arg15[%266, %c0_168] : memref<64x32xf32, #tpu.memory_space<vmem>>, vector<8x32xf32>
    %c1_169 = arith.constant 1 : index
    %c0_170 = arith.constant 0 : index
    %c0_171 = arith.constant 0 : index
    %268 = vector.load %arg13[%c1_169, %c0_170, %c0_171] : memref<4x32x32xf32, #tpu.memory_space<vmem>>, vector<1x32x32xf32>
    %269 = vector.shape_cast %268 : vector<1x32x32xf32> to vector<32x32xf32>
    %cst_172 = arith.constant dense<0.000000e+00> : vector<8x32xf32>
    %270 = tpu.matmul %255, %269, %cst_172 {dimension_numbers = #tpu.dot_dimension_numbers<[1], [0], [0], [1], [0, 0, 1, 1], [], []>} : vector<8x32xf32>, vector<32x32xf32>, vector<8x32xf32> -> vector<8x32xf32>
    %271 = arith.addf %267, %270 : vector<8x32xf32>
    %272 = arith.index_cast %259 : i32 to index
    %c0_173 = arith.constant 0 : index
    %273 = vector.load %arg16[%272, %c0_173] : memref<64x32xf32, #tpu.memory_space<vmem>>, vector<8x32xf32>
    %c2_174 = arith.constant 2 : index
    %c0_175 = arith.constant 0 : index
    %c0_176 = arith.constant 0 : index
    %274 = vector.load %arg13[%c2_174, %c0_175, %c0_176] : memref<4x32x32xf32, #tpu.memory_space<vmem>>, vector<1x32x32xf32>
    %275 = vector.shape_cast %274 : vector<1x32x32xf32> to vector<32x32xf32>
    %cst_177 = arith.constant dense<0.000000e+00> : vector<8x32xf32>
    %276 = tpu.matmul %255, %275, %cst_177 {dimension_numbers = #tpu.dot_dimension_numbers<[1], [0], [0], [1], [0, 0, 1, 1], [], []>} : vector<8x32xf32>, vector<32x32xf32>, vector<8x32xf32> -> vector<8x32xf32>
    %277 = arith.addf %273, %276 : vector<8x32xf32>
    %278 = arith.index_cast %259 : i32 to index
    %c0_178 = arith.constant 0 : index
    %279 = vector.load %arg17[%278, %c0_178] : memref<64x32xf32, #tpu.memory_space<vmem>>, vector<8x32xf32>
    %c3_179 = arith.constant 3 : index
    %c0_180 = arith.constant 0 : index
    %c0_181 = arith.constant 0 : index
    %280 = vector.load %arg13[%c3_179, %c0_180, %c0_181] : memref<4x32x32xf32, #tpu.memory_space<vmem>>, vector<1x32x32xf32>
    %281 = vector.shape_cast %280 : vector<1x32x32xf32> to vector<32x32xf32>
    %cst_182 = arith.constant dense<0.000000e+00> : vector<8x32xf32>
    %282 = tpu.matmul %255, %281, %cst_182 {dimension_numbers = #tpu.dot_dimension_numbers<[1], [0], [0], [1], [0, 0, 1, 1], [], []>} : vector<8x32xf32>, vector<32x32xf32>, vector<8x32xf32> -> vector<8x32xf32>
    %283 = arith.addf %279, %282 : vector<8x32xf32>
    %cst_183 = arith.constant 5.000000e-01 : f32
    %284 = vector.broadcast %cst_183 : f32 to vector<8x32xf32>
    %285 = arith.mulf %284, %265 : vector<8x32xf32>
    %286 = math.tanh %285 : vector<8x32xf32>
    %cst_184 = arith.constant 5.000000e-01 : f32
    %287 = vector.broadcast %cst_184 : f32 to vector<8x32xf32>
    %288 = arith.mulf %287, %286 : vector<8x32xf32>
    %cst_185 = arith.constant 5.000000e-01 : f32
    %289 = vector.broadcast %cst_185 : f32 to vector<8x32xf32>
    %290 = arith.addf %288, %289 : vector<8x32xf32>
    %cst_186 = arith.constant 5.000000e-01 : f32
    %291 = vector.broadcast %cst_186 : f32 to vector<8x32xf32>
    %292 = arith.mulf %291, %271 : vector<8x32xf32>
    %293 = math.tanh %292 : vector<8x32xf32>
    %cst_187 = arith.constant 5.000000e-01 : f32
    %294 = vector.broadcast %cst_187 : f32 to vector<8x32xf32>
    %295 = arith.mulf %294, %293 : vector<8x32xf32>
    %cst_188 = arith.constant 5.000000e-01 : f32
    %296 = vector.broadcast %cst_188 : f32 to vector<8x32xf32>
    %297 = arith.addf %295, %296 : vector<8x32xf32>
    %298 = math.tanh %277 : vector<8x32xf32>
    %cst_189 = arith.constant 5.000000e-01 : f32
    %299 = vector.broadcast %cst_189 : f32 to vector<8x32xf32>
    %300 = arith.mulf %299, %283 : vector<8x32xf32>
    %301 = math.tanh %300 : vector<8x32xf32>
    %cst_190 = arith.constant 5.000000e-01 : f32
    %302 = vector.broadcast %cst_190 : f32 to vector<8x32xf32>
    %303 = arith.mulf %302, %301 : vector<8x32xf32>
    %cst_191 = arith.constant 5.000000e-01 : f32
    %304 = vector.broadcast %cst_191 : f32 to vector<8x32xf32>
    %305 = arith.addf %303, %304 : vector<8x32xf32>
    %306 = arith.mulf %297, %253 : vector<8x32xf32>
    %307 = arith.mulf %290, %298 : vector<8x32xf32>
    %308 = arith.addf %306, %307 : vector<8x32xf32>
    %309 = math.tanh %308 : vector<8x32xf32>
    %310 = arith.mulf %305, %309 : vector<8x32xf32>
    %311 = arith.index_cast %259 : i32 to index
    %c0_192 = arith.constant 0 : index
    %312 = vector.load %arg7[%311, %c0_192] : memref<64x32xf32, #tpu.memory_space<vmem>>, vector<8x32xf32>
    tpu.vector_store %arg7[%311, %c0_192], %310 {strides = array<i32>} : memref<64x32xf32, #tpu.memory_space<vmem>>, vector<8x32xf32>,
    %c5_i32 = arith.constant 5 : i32
    %c8_i32_193 = arith.constant 8 : i32
    %313 = arith.muli %c5_i32, %c8_i32_193 : i32
    %314 = tpu.assume_multiple %313, 8 : i32
    %315 = arith.index_cast %314 : i32 to index
    %c0_194 = arith.constant 0 : index
    %316 = vector.load %arg14[%315, %c0_194] : memref<64x32xf32, #tpu.memory_space<vmem>>, vector<8x32xf32>
    %c0_195 = arith.constant 0 : index
    %c0_196 = arith.constant 0 : index
    %c0_197 = arith.constant 0 : index
    %317 = vector.load %arg13[%c0_195, %c0_196, %c0_197] : memref<4x32x32xf32, #tpu.memory_space<vmem>>, vector<1x32x32xf32>
    %318 = vector.shape_cast %317 : vector<1x32x32xf32> to vector<32x32xf32>
    %cst_198 = arith.constant dense<0.000000e+00> : vector<8x32xf32>
    %319 = tpu.matmul %310, %318, %cst_198 {dimension_numbers = #tpu.dot_dimension_numbers<[1], [0], [0], [1], [0, 0, 1, 1], [], []>} : vector<8x32xf32>, vector<32x32xf32>, vector<8x32xf32> -> vector<8x32xf32>
    %320 = arith.addf %316, %319 : vector<8x32xf32>
    %321 = arith.index_cast %314 : i32 to index
    %c0_199 = arith.constant 0 : index
    %322 = vector.load %arg15[%321, %c0_199] : memref<64x32xf32, #tpu.memory_space<vmem>>, vector<8x32xf32>
    %c1_200 = arith.constant 1 : index
    %c0_201 = arith.constant 0 : index
    %c0_202 = arith.constant 0 : index
    %323 = vector.load %arg13[%c1_200, %c0_201, %c0_202] : memref<4x32x32xf32, #tpu.memory_space<vmem>>, vector<1x32x32xf32>
    %324 = vector.shape_cast %323 : vector<1x32x32xf32> to vector<32x32xf32>
    %cst_203 = arith.constant dense<0.000000e+00> : vector<8x32xf32>
    %325 = tpu.matmul %310, %324, %cst_203 {dimension_numbers = #tpu.dot_dimension_numbers<[1], [0], [0], [1], [0, 0, 1, 1], [], []>} : vector<8x32xf32>, vector<32x32xf32>, vector<8x32xf32> -> vector<8x32xf32>
    %326 = arith.addf %322, %325 : vector<8x32xf32>
    %327 = arith.index_cast %314 : i32 to index
    %c0_204 = arith.constant 0 : index
    %328 = vector.load %arg16[%327, %c0_204] : memref<64x32xf32, #tpu.memory_space<vmem>>, vector<8x32xf32>
    %c2_205 = arith.constant 2 : index
    %c0_206 = arith.constant 0 : index
    %c0_207 = arith.constant 0 : index
    %329 = vector.load %arg13[%c2_205, %c0_206, %c0_207] : memref<4x32x32xf32, #tpu.memory_space<vmem>>, vector<1x32x32xf32>
    %330 = vector.shape_cast %329 : vector<1x32x32xf32> to vector<32x32xf32>
    %cst_208 = arith.constant dense<0.000000e+00> : vector<8x32xf32>
    %331 = tpu.matmul %310, %330, %cst_208 {dimension_numbers = #tpu.dot_dimension_numbers<[1], [0], [0], [1], [0, 0, 1, 1], [], []>} : vector<8x32xf32>, vector<32x32xf32>, vector<8x32xf32> -> vector<8x32xf32>
    %332 = arith.addf %328, %331 : vector<8x32xf32>
    %333 = arith.index_cast %314 : i32 to index
    %c0_209 = arith.constant 0 : index
    %334 = vector.load %arg17[%333, %c0_209] : memref<64x32xf32, #tpu.memory_space<vmem>>, vector<8x32xf32>
    %c3_210 = arith.constant 3 : index
    %c0_211 = arith.constant 0 : index
    %c0_212 = arith.constant 0 : index
    %335 = vector.load %arg13[%c3_210, %c0_211, %c0_212] : memref<4x32x32xf32, #tpu.memory_space<vmem>>, vector<1x32x32xf32>
    %336 = vector.shape_cast %335 : vector<1x32x32xf32> to vector<32x32xf32>
    %cst_213 = arith.constant dense<0.000000e+00> : vector<8x32xf32>
    %337 = tpu.matmul %310, %336, %cst_213 {dimension_numbers = #tpu.dot_dimension_numbers<[1], [0], [0], [1], [0, 0, 1, 1], [], []>} : vector<8x32xf32>, vector<32x32xf32>, vector<8x32xf32> -> vector<8x32xf32>
    %338 = arith.addf %334, %337 : vector<8x32xf32>
    %cst_214 = arith.constant 5.000000e-01 : f32
    %339 = vector.broadcast %cst_214 : f32 to vector<8x32xf32>
    %340 = arith.mulf %339, %320 : vector<8x32xf32>
    %341 = math.tanh %340 : vector<8x32xf32>
    %cst_215 = arith.constant 5.000000e-01 : f32
    %342 = vector.broadcast %cst_215 : f32 to vector<8x32xf32>
    %343 = arith.mulf %342, %341 : vector<8x32xf32>
    %cst_216 = arith.constant 5.000000e-01 : f32
    %344 = vector.broadcast %cst_216 : f32 to vector<8x32xf32>
    %345 = arith.addf %343, %344 : vector<8x32xf32>
    %cst_217 = arith.constant 5.000000e-01 : f32
    %346 = vector.broadcast %cst_217 : f32 to vector<8x32xf32>
    %347 = arith.mulf %346, %326 : vector<8x32xf32>
    %348 = math.tanh %347 : vector<8x32xf32>
    %cst_218 = arith.constant 5.000000e-01 : f32
    %349 = vector.broadcast %cst_218 : f32 to vector<8x32xf32>
    %350 = arith.mulf %349, %348 : vector<8x32xf32>
    %cst_219 = arith.constant 5.000000e-01 : f32
    %351 = vector.broadcast %cst_219 : f32 to vector<8x32xf32>
    %352 = arith.addf %350, %351 : vector<8x32xf32>
    %353 = math.tanh %332 : vector<8x32xf32>
    %cst_220 = arith.constant 5.000000e-01 : f32
    %354 = vector.broadcast %cst_220 : f32 to vector<8x32xf32>
    %355 = arith.mulf %354, %338 : vector<8x32xf32>
    %356 = math.tanh %355 : vector<8x32xf32>
    %cst_221 = arith.constant 5.000000e-01 : f32
    %357 = vector.broadcast %cst_221 : f32 to vector<8x32xf32>
    %358 = arith.mulf %357, %356 : vector<8x32xf32>
    %cst_222 = arith.constant 5.000000e-01 : f32
    %359 = vector.broadcast %cst_222 : f32 to vector<8x32xf32>
    %360 = arith.addf %358, %359 : vector<8x32xf32>
    %361 = arith.mulf %352, %308 : vector<8x32xf32>
    %362 = arith.mulf %345, %353 : vector<8x32xf32>
    %363 = arith.addf %361, %362 : vector<8x32xf32>
    %364 = math.tanh %363 : vector<8x32xf32>
    %365 = arith.mulf %360, %364 : vector<8x32xf32>
    %366 = arith.index_cast %314 : i32 to index
    %c0_223 = arith.constant 0 : index
    %367 = vector.load %arg7[%366, %c0_223] : memref<64x32xf32, #tpu.memory_space<vmem>>, vector<8x32xf32>
    tpu.vector_store %arg7[%366, %c0_223], %365 {strides = array<i32>} : memref<64x32xf32, #tpu.memory_space<vmem>>, vector<8x32xf32>,
    %c6_i32 = arith.constant 6 : i32
    %c8_i32_224 = arith.constant 8 : i32
    %368 = arith.muli %c6_i32, %c8_i32_224 : i32
    %369 = tpu.assume_multiple %368, 8 : i32
    %370 = arith.index_cast %369 : i32 to index
    %c0_225 = arith.constant 0 : index
    %371 = vector.load %arg14[%370, %c0_225] : memref<64x32xf32, #tpu.memory_space<vmem>>, vector<8x32xf32>
    %c0_226 = arith.constant 0 : index
    %c0_227 = arith.constant 0 : index
    %c0_228 = arith.constant 0 : index
    %372 = vector.load %arg13[%c0_226, %c0_227, %c0_228] : memref<4x32x32xf32, #tpu.memory_space<vmem>>, vector<1x32x32xf32>
    %373 = vector.shape_cast %372 : vector<1x32x32xf32> to vector<32x32xf32>
    %cst_229 = arith.constant dense<0.000000e+00> : vector<8x32xf32>
    %374 = tpu.matmul %365, %373, %cst_229 {dimension_numbers = #tpu.dot_dimension_numbers<[1], [0], [0], [1], [0, 0, 1, 1], [], []>} : vector<8x32xf32>, vector<32x32xf32>, vector<8x32xf32> -> vector<8x32xf32>
    %375 = arith.addf %371, %374 : vector<8x32xf32>
    %376 = arith.index_cast %369 : i32 to index
    %c0_230 = arith.constant 0 : index
    %377 = vector.load %arg15[%376, %c0_230] : memref<64x32xf32, #tpu.memory_space<vmem>>, vector<8x32xf32>
    %c1_231 = arith.constant 1 : index
    %c0_232 = arith.constant 0 : index
    %c0_233 = arith.constant 0 : index
    %378 = vector.load %arg13[%c1_231, %c0_232, %c0_233] : memref<4x32x32xf32, #tpu.memory_space<vmem>>, vector<1x32x32xf32>
    %379 = vector.shape_cast %378 : vector<1x32x32xf32> to vector<32x32xf32>
    %cst_234 = arith.constant dense<0.000000e+00> : vector<8x32xf32>
    %380 = tpu.matmul %365, %379, %cst_234 {dimension_numbers = #tpu.dot_dimension_numbers<[1], [0], [0], [1], [0, 0, 1, 1], [], []>} : vector<8x32xf32>, vector<32x32xf32>, vector<8x32xf32> -> vector<8x32xf32>
    %381 = arith.addf %377, %380 : vector<8x32xf32>
    %382 = arith.index_cast %369 : i32 to index
    %c0_235 = arith.constant 0 : index
    %383 = vector.load %arg16[%382, %c0_235] : memref<64x32xf32, #tpu.memory_space<vmem>>, vector<8x32xf32>
    %c2_236 = arith.constant 2 : index
    %c0_237 = arith.constant 0 : index
    %c0_238 = arith.constant 0 : index
    %384 = vector.load %arg13[%c2_236, %c0_237, %c0_238] : memref<4x32x32xf32, #tpu.memory_space<vmem>>, vector<1x32x32xf32>
    %385 = vector.shape_cast %384 : vector<1x32x32xf32> to vector<32x32xf32>
    %cst_239 = arith.constant dense<0.000000e+00> : vector<8x32xf32>
    %386 = tpu.matmul %365, %385, %cst_239 {dimension_numbers = #tpu.dot_dimension_numbers<[1], [0], [0], [1], [0, 0, 1, 1], [], []>} : vector<8x32xf32>, vector<32x32xf32>, vector<8x32xf32> -> vector<8x32xf32>
    %387 = arith.addf %383, %386 : vector<8x32xf32>
    %388 = arith.index_cast %369 : i32 to index
    %c0_240 = arith.constant 0 : index
    %389 = vector.load %arg17[%388, %c0_240] : memref<64x32xf32, #tpu.memory_space<vmem>>, vector<8x32xf32>
    %c3_241 = arith.constant 3 : index
    %c0_242 = arith.constant 0 : index
    %c0_243 = arith.constant 0 : index
    %390 = vector.load %arg13[%c3_241, %c0_242, %c0_243] : memref<4x32x32xf32, #tpu.memory_space<vmem>>, vector<1x32x32xf32>
    %391 = vector.shape_cast %390 : vector<1x32x32xf32> to vector<32x32xf32>
    %cst_244 = arith.constant dense<0.000000e+00> : vector<8x32xf32>
    %392 = tpu.matmul %365, %391, %cst_244 {dimension_numbers = #tpu.dot_dimension_numbers<[1], [0], [0], [1], [0, 0, 1, 1], [], []>} : vector<8x32xf32>, vector<32x32xf32>, vector<8x32xf32> -> vector<8x32xf32>
    %393 = arith.addf %389, %392 : vector<8x32xf32>
    %cst_245 = arith.constant 5.000000e-01 : f32
    %394 = vector.broadcast %cst_245 : f32 to vector<8x32xf32>
    %395 = arith.mulf %394, %375 : vector<8x32xf32>
    %396 = math.tanh %395 : vector<8x32xf32>
    %cst_246 = arith.constant 5.000000e-01 : f32
    %397 = vector.broadcast %cst_246 : f32 to vector<8x32xf32>
    %398 = arith.mulf %397, %396 : vector<8x32xf32>
    %cst_247 = arith.constant 5.000000e-01 : f32
    %399 = vector.broadcast %cst_247 : f32 to vector<8x32xf32>
    %400 = arith.addf %398, %399 : vector<8x32xf32>
    %cst_248 = arith.constant 5.000000e-01 : f32
    %401 = vector.broadcast %cst_248 : f32 to vector<8x32xf32>
    %402 = arith.mulf %401, %381 : vector<8x32xf32>
    %403 = math.tanh %402 : vector<8x32xf32>
    %cst_249 = arith.constant 5.000000e-01 : f32
    %404 = vector.broadcast %cst_249 : f32 to vector<8x32xf32>
    %405 = arith.mulf %404, %403 : vector<8x32xf32>
    %cst_250 = arith.constant 5.000000e-01 : f32
    %406 = vector.broadcast %cst_250 : f32 to vector<8x32xf32>
    %407 = arith.addf %405, %406 : vector<8x32xf32>
    %408 = math.tanh %387 : vector<8x32xf32>
    %cst_251 = arith.constant 5.000000e-01 : f32
    %409 = vector.broadcast %cst_251 : f32 to vector<8x32xf32>
    %410 = arith.mulf %409, %393 : vector<8x32xf32>
    %411 = math.tanh %410 : vector<8x32xf32>
    %cst_252 = arith.constant 5.000000e-01 : f32
    %412 = vector.broadcast %cst_252 : f32 to vector<8x32xf32>
    %413 = arith.mulf %412, %411 : vector<8x32xf32>
    %cst_253 = arith.constant 5.000000e-01 : f32
    %414 = vector.broadcast %cst_253 : f32 to vector<8x32xf32>
    %415 = arith.addf %413, %414 : vector<8x32xf32>
    %416 = arith.mulf %407, %363 : vector<8x32xf32>
    %417 = arith.mulf %400, %408 : vector<8x32xf32>
    %418 = arith.addf %416, %417 : vector<8x32xf32>
    %419 = math.tanh %418 : vector<8x32xf32>
    %420 = arith.mulf %415, %419 : vector<8x32xf32>
    %421 = arith.index_cast %369 : i32 to index
    %c0_254 = arith.constant 0 : index
    %422 = vector.load %arg7[%421, %c0_254] : memref<64x32xf32, #tpu.memory_space<vmem>>, vector<8x32xf32>
    tpu.vector_store %arg7[%421, %c0_254], %420 {strides = array<i32>} : memref<64x32xf32, #tpu.memory_space<vmem>>, vector<8x32xf32>,
    %c7_i32 = arith.constant 7 : i32
    %c8_i32_255 = arith.constant 8 : i32
    %423 = arith.muli %c7_i32, %c8_i32_255 : i32
    %424 = tpu.assume_multiple %423, 8 : i32
    %425 = arith.index_cast %424 : i32 to index
    %c0_256 = arith.constant 0 : index
    %426 = vector.load %arg14[%425, %c0_256] : memref<64x32xf32, #tpu.memory_space<vmem>>, vector<8x32xf32>
    %c0_257 = arith.constant 0 : index
    %c0_258 = arith.constant 0 : index
    %c0_259 = arith.constant 0 : index
    %427 = vector.load %arg13[%c0_257, %c0_258, %c0_259] : memref<4x32x32xf32, #tpu.memory_space<vmem>>, vector<1x32x32xf32>
    %428 = vector.shape_cast %427 : vector<1x32x32xf32> to vector<32x32xf32>
    %cst_260 = arith.constant dense<0.000000e+00> : vector<8x32xf32>
    %429 = tpu.matmul %420, %428, %cst_260 {dimension_numbers = #tpu.dot_dimension_numbers<[1], [0], [0], [1], [0, 0, 1, 1], [], []>} : vector<8x32xf32>, vector<32x32xf32>, vector<8x32xf32> -> vector<8x32xf32>
    %430 = arith.addf %426, %429 : vector<8x32xf32>
    %431 = arith.index_cast %424 : i32 to index
    %c0_261 = arith.constant 0 : index
    %432 = vector.load %arg15[%431, %c0_261] : memref<64x32xf32, #tpu.memory_space<vmem>>, vector<8x32xf32>
    %c1_262 = arith.constant 1 : index
    %c0_263 = arith.constant 0 : index
    %c0_264 = arith.constant 0 : index
    %433 = vector.load %arg13[%c1_262, %c0_263, %c0_264] : memref<4x32x32xf32, #tpu.memory_space<vmem>>, vector<1x32x32xf32>
    %434 = vector.shape_cast %433 : vector<1x32x32xf32> to vector<32x32xf32>
    %cst_265 = arith.constant dense<0.000000e+00> : vector<8x32xf32>
    %435 = tpu.matmul %420, %434, %cst_265 {dimension_numbers = #tpu.dot_dimension_numbers<[1], [0], [0], [1], [0, 0, 1, 1], [], []>} : vector<8x32xf32>, vector<32x32xf32>, vector<8x32xf32> -> vector<8x32xf32>
    %436 = arith.addf %432, %435 : vector<8x32xf32>
    %437 = arith.index_cast %424 : i32 to index
    %c0_266 = arith.constant 0 : index
    %438 = vector.load %arg16[%437, %c0_266] : memref<64x32xf32, #tpu.memory_space<vmem>>, vector<8x32xf32>
    %c2_267 = arith.constant 2 : index
    %c0_268 = arith.constant 0 : index
    %c0_269 = arith.constant 0 : index
    %439 = vector.load %arg13[%c2_267, %c0_268, %c0_269] : memref<4x32x32xf32, #tpu.memory_space<vmem>>, vector<1x32x32xf32>
    %440 = vector.shape_cast %439 : vector<1x32x32xf32> to vector<32x32xf32>
    %cst_270 = arith.constant dense<0.000000e+00> : vector<8x32xf32>
    %441 = tpu.matmul %420, %440, %cst_270 {dimension_numbers = #tpu.dot_dimension_numbers<[1], [0], [0], [1], [0, 0, 1, 1], [], []>} : vector<8x32xf32>, vector<32x32xf32>, vector<8x32xf32> -> vector<8x32xf32>
    %442 = arith.addf %438, %441 : vector<8x32xf32>
    %443 = arith.index_cast %424 : i32 to index
    %c0_271 = arith.constant 0 : index
    %444 = vector.load %arg17[%443, %c0_271] : memref<64x32xf32, #tpu.memory_space<vmem>>, vector<8x32xf32>
    %c3_272 = arith.constant 3 : index
    %c0_273 = arith.constant 0 : index
    %c0_274 = arith.constant 0 : index
    %445 = vector.load %arg13[%c3_272, %c0_273, %c0_274] : memref<4x32x32xf32, #tpu.memory_space<vmem>>, vector<1x32x32xf32>
    %446 = vector.shape_cast %445 : vector<1x32x32xf32> to vector<32x32xf32>
    %cst_275 = arith.constant dense<0.000000e+00> : vector<8x32xf32>
    %447 = tpu.matmul %420, %446, %cst_275 {dimension_numbers = #tpu.dot_dimension_numbers<[1], [0], [0], [1], [0, 0, 1, 1], [], []>} : vector<8x32xf32>, vector<32x32xf32>, vector<8x32xf32> -> vector<8x32xf32>
    %448 = arith.addf %444, %447 : vector<8x32xf32>
    %cst_276 = arith.constant 5.000000e-01 : f32
    %449 = vector.broadcast %cst_276 : f32 to vector<8x32xf32>
    %450 = arith.mulf %449, %430 : vector<8x32xf32>
    %451 = math.tanh %450 : vector<8x32xf32>
    %cst_277 = arith.constant 5.000000e-01 : f32
    %452 = vector.broadcast %cst_277 : f32 to vector<8x32xf32>
    %453 = arith.mulf %452, %451 : vector<8x32xf32>
    %cst_278 = arith.constant 5.000000e-01 : f32
    %454 = vector.broadcast %cst_278 : f32 to vector<8x32xf32>
    %455 = arith.addf %453, %454 : vector<8x32xf32>
    %cst_279 = arith.constant 5.000000e-01 : f32
    %456 = vector.broadcast %cst_279 : f32 to vector<8x32xf32>
    %457 = arith.mulf %456, %436 : vector<8x32xf32>
    %458 = math.tanh %457 : vector<8x32xf32>
    %cst_280 = arith.constant 5.000000e-01 : f32
    %459 = vector.broadcast %cst_280 : f32 to vector<8x32xf32>
    %460 = arith.mulf %459, %458 : vector<8x32xf32>
    %cst_281 = arith.constant 5.000000e-01 : f32
    %461 = vector.broadcast %cst_281 : f32 to vector<8x32xf32>
    %462 = arith.addf %460, %461 : vector<8x32xf32>
    %463 = math.tanh %442 : vector<8x32xf32>
    %cst_282 = arith.constant 5.000000e-01 : f32
    %464 = vector.broadcast %cst_282 : f32 to vector<8x32xf32>
    %465 = arith.mulf %464, %448 : vector<8x32xf32>
    %466 = math.tanh %465 : vector<8x32xf32>
    %cst_283 = arith.constant 5.000000e-01 : f32
    %467 = vector.broadcast %cst_283 : f32 to vector<8x32xf32>
    %468 = arith.mulf %467, %466 : vector<8x32xf32>
    %cst_284 = arith.constant 5.000000e-01 : f32
    %469 = vector.broadcast %cst_284 : f32 to vector<8x32xf32>
    %470 = arith.addf %468, %469 : vector<8x32xf32>
    %471 = arith.mulf %462, %418 : vector<8x32xf32>
    %472 = arith.mulf %455, %463 : vector<8x32xf32>
    %473 = arith.addf %471, %472 : vector<8x32xf32>
    %474 = math.tanh %473 : vector<8x32xf32>
    %475 = arith.mulf %470, %474 : vector<8x32xf32>
    %476 = arith.index_cast %424 : i32 to index
    %c0_285 = arith.constant 0 : index
    %477 = vector.load %arg7[%476, %c0_285] : memref<64x32xf32, #tpu.memory_space<vmem>>, vector<8x32xf32>
    tpu.vector_store %arg7[%476, %c0_285], %475 {strides = array<i32>} : memref<64x32xf32, #tpu.memory_space<vmem>>, vector<8x32xf32>,
    %c8_i32_286 = arith.constant 8 : i32
    %c0_287 = arith.constant 0 : index
    %c0_288 = arith.constant 0 : index
    %478 = vector.load %arg10[%c0_287, %c0_288] : memref<8x32xf32, #tpu.memory_space<vmem>>, vector<8x32xf32>
    tpu.vector_store %arg10[%c0_287, %c0_288], %475 {strides = array<i32>} : memref<8x32xf32, #tpu.memory_space<vmem>>, vector<8x32xf32>,
    %c0_289 = arith.constant 0 : index
    %c0_290 = arith.constant 0 : index
    %479 = vector.load %arg11[%c0_289, %c0_290] : memref<8x32xf32, #tpu.memory_space<vmem>>, vector<8x32xf32>
    tpu.vector_store %arg11[%c0_289, %c0_290], %473 {strides = array<i32>} : memref<8x32xf32, #tpu.memory_space<vmem>>, vector<8x32xf32>,
    %c0_291 = arith.constant 0 : index
    %c0_292 = arith.constant 0 : index
    %480 = vector.load %arg8[%c0_291, %c0_292] : memref<8x32xf32, #tpu.memory_space<vmem>>, vector<8x32xf32>
    tpu.vector_store %arg8[%c0_291, %c0_292], %475 {strides = array<i32>} : memref<8x32xf32, #tpu.memory_space<vmem>>, vector<8x32xf32>,
    %c0_293 = arith.constant 0 : index
    %c0_294 = arith.constant 0 : index
    %481 = vector.load %arg9[%c0_293, %c0_294] : memref<8x32xf32, #tpu.memory_space<vmem>>, vector<8x32xf32>
    tpu.vector_store %arg9[%c0_293, %c0_294], %473 {strides = array<i32>} : memref<8x32xf32, #tpu.memory_space<vmem>>, vector<8x32xf32>,
    return
  }
  func.func @transform_0(%arg0: i32) -> (i32, i32) {
    %c0_i32 = arith.constant 0 : i32
    %c0_i32_0 = arith.constant 0 : i32
    return %arg0, %c0_i32 : i32, i32
  }
  func.func @transform_1(%arg0: i32) -> (i32, i32) {
    %c0_i32 = arith.constant 0 : i32
    %c0_i32_0 = arith.constant 0 : i32
    %c0_i32_1 = arith.constant 0 : i32
    return %c0_i32, %c0_i32_0 : i32, i32
  }
  func.func @transform_2(%arg0: i32) -> (i32, i32) {
    %c0_i32 = arith.constant 0 : i32
    %c0_i32_0 = arith.constant 0 : i32
    %c0_i32_1 = arith.constant 0 : i32
    return %c0_i32, %c0_i32_0 : i32, i32
  }
  func.func @transform_3(%arg0: i32) -> (i32, i32, i32) {
    %c0_i32 = arith.constant 0 : i32
    %c0_i32_0 = arith.constant 0 : i32
    %c0_i32_1 = arith.constant 0 : i32
    %c0_i32_2 = arith.constant 0 : i32
    return %c0_i32, %c0_i32_0, %c0_i32_1 : i32, i32, i32
  }
  func.func @transform_6(%arg0: i32) -> (i32, i32) {
    %c0_i32 = arith.constant 0 : i32
    %c0_i32_0 = arith.constant 0 : i32
    return %arg0, %c0_i32 : i32, i32
  }
  func.func @transform_7(%arg0: i32) -> (i32, i32) {
    %c0_i32 = arith.constant 0 : i32
    %c0_i32_0 = arith.constant 0 : i32
    %c0_i32_1 = arith.constant 0 : i32
    return %c0_i32, %c0_i32_0 : i32, i32
  }
  func.func @transform_8(%arg0: i32) -> (i32, i32) {
    %c0_i32 = arith.constant 0 : i32
    %c0_i32_0 = arith.constant 0 : i32
    %c0_i32_1 = arith.constant 0 : i32
    return %c0_i32, %c0_i32_0 : i32, i32
  }
}

</mosaic_0001>

<bundles_post_ra>
// kernel: tpu_custom_call.1
= control target key start
LH: loop header
LB: loop body
LE: loop exit
PB: predicated region body
PF: predicated region fallthrough
CT: control target
= control target key end

     0   :  { %14 = vsyncpa [#allocation12], 0  ;;  %s4925_s0 = inlined_call_operand.vmem [shape: f32[64,16], index: 0, kind: input, shape index: {}]   ;;  %s4926_s1 = inlined_call_operand.vmem [shape: f32[8,32], index: 1, kind: input, shape index: {}]   ;;  %s4927_s2 = inlined_call_operand.vmem [shape: f32[8,32], index: 2, kind: input, shape index: {}]   ;;  %s4928_s3 = inlined_call_operand.vmem [shape: f32[4,1,32], index: 3, kind: input, shape index: {}]   ;;  %s4929_s4 = inlined_call_operand.vmem [shape: f32[4,16,32], index: 4, kind: input, shape index: {}]   ;;  %s4930_s5 = inlined_call_operand.hbm [shape: f32[4,32,32], index: 5, kind: input, shape index: {}]   ;;  %s4931_s6 = inlined_call_operand.vmem [shape: f32[64,32], index: 6, kind: output, shape index: {0}]   ;;  %s4932_s7 = inlined_call_operand.hbm [shape: f32[8,32], index: 7, kind: output, shape index: {1}]   ;;  %s4933_s8 = inlined_call_operand.hbm [shape: f32[8,32], index: 8, kind: output, shape index: {2}]  }
   0x1   :  { %15 = vsyncpa [#allocation14], 0  ;;  %v60_v0 = vld [vmem:[%s4929_s4] sm:$0xff]  ;;  %v62_v1 = vld [vmem:[%s4929_s4 + $0x8] sm:$0xff] }
   0x2   :  { %v64_v2 = vld [vmem:[%s4929_s4 + $0x10] sm:$0xff]  ;;  %v66_v3 = vld [vmem:[%s4929_s4 + $0x18] sm:$0xff]  ;;  %v68_v4 = vld [vmem:[%s4929_s4 + $0x20] sm:$0xff] }
   0x3   :  { %v70_v5 = vld [vmem:[%s4929_s4 + $0x28] sm:$0xff]  ;;  %v72_v6 = vld [vmem:[%s4929_s4 + $0x30] sm:$0xff]  ;;  %v74_v7 = vld [vmem:[%s4929_s4 + $0x38] sm:$0xff] }
   0x4   :  { %83 = vsyncadd [#allocation10], 1024  ;;  %v96_v8 = vld [vmem:[%s4926_s1] sm:$0xff]  ;;  %vm97_vm0 = vcmask 261120   ;;  %s4406_s25 = smov [#allocation5]   ;;  %s4332_s4 = scalar_lea.hbm %s4930_s5, 2048 }
   0x5   :  { %v99_v9 = vld [vmem:[%s4927_s2] sm:$0xff]  ;;  %s92_s26 = sshll.u32 %s4406_s25, 4  ;;  %98 = vst.msk [vmem:[#allocation2] sm:$0xff] %vm97_vm0, %v96_v8  ;;  %p4333_p0 = scmp.ne.s32.totalorder %s4930_s5, %s4332_s4  ;;  %s93_s26 = int_to_ptr.vmem [resolvable:$true] %s92_s26 }
   0x6   :  { %100 = vst.msk [vmem:[#allocation3] sm:$0xff] %vm97_vm0, %v99_v9  ;;  %p4336_p1 = scmp.lt.u32.totalorder %s4332_s4, %s4930_s5 }
   0x8   :  { %p4338_p2 = pnand %p4336_p1, %p4333_p0 }
   0xa   :  { %4341 = shalt.err (!%p4338_p2)  }
   0xb   :  { %s4342_s2 = scalar_lea.vmem %s93_s26, 2048  ;;  %p4347_p4 = scmp.lt.s32.totalorder %s93_s26, %s93_s26 }
   0xc   :  { %p4343_p3 = scmp.ne.s32.totalorder %s93_s26, %s4342_s2  ;;  %p4348_p5 = scmp.lt.s32.totalorder %s4342_s2, %s4342_s2 }
   0xe   :  { %p4349_p6 = por %p4348_p5, %p4347_p4 }
  0x10   :  { %p4350_p7 = pnand %p4349_p6, %p4343_p3 }
  0x12   :  { %4353 = shalt.err (!%p4350_p7)  }
  0x13   :  { %95 = dma.hbm_to_vmem [thread:$0]  %s4930_s5, 2048, %s93_s26, [#allocation10 + $0x1] }
  0x14   :  { %4398 = dma.done.wait [#allocation10], 1024 }
  0x15   :  { %4399 = vsyncadd [#allocation10], 4294966272 }
  0x16   :  { %4400 = dma.done.wait [#allocation10 + $0x1], 2048 }
  0x17   :  { %4401 = vsyncadd [#allocation10 + $0x1], 4294965248  ;;  %v4038_v10 = vpack.c.bf16 %v62_v1, %v60_v0  ;;  %v4042_v11 = vpack.c.bf16 %v66_v3, %v64_v2  ;;  %v4046_v12 = vpack.c.bf16 %v70_v5, %v68_v4  ;;  %v4050_v13 = vpack.c.bf16 %v74_v7, %v72_v6  ;;  %v109_v14 = vld [vmem:[%s4925_s0] sm:$0xff]  ;;  %v110_v15 = vld [vmem:[%s4925_s0 + $0x8] sm:$0xff]  ;;  %s4410_s21 = smov [#allocation13]  }
  0x18   :  { %vm126_vm1 = vcmask 130048   ;;  %v111_v16 = vld [vmem:[%s4925_s0 + $0x10] sm:$0xff]  ;;  %v112_v17 = vld [vmem:[%s4925_s0 + $0x18] sm:$0xff]  ;;  %v113_v18 = vld [vmem:[%s4925_s0 + $0x20] sm:$0xff]  ;;  %v4407_v19 = vmov 0.0|0.0   ;;  %vm4408_vm2 = vmmov 0  }
  0x19   :  { %4039 = vmatprep.subr.bf16.mxu0 %v4038_v10  ;;  %4043 = vmatprep.subr.bf16.mxu1 %v4042_v11  ;;  %v114_v20 = vld [vmem:[%s4925_s0 + $0x28] sm:$0xff]  ;;  %v115_v21 = vld [vmem:[%s4925_s0 + $0x30] sm:$0xff]  ;;  %v116_v22 = vld [vmem:[%s4925_s0 + $0x38] sm:$0xff]  ;;  %v4409_v39 = vmov 0.0   ;;  %s3307_s22 = sshll.u32 %s4410_s21, 4  ;;  %s3308_s22 = int_to_ptr.vmem [resolvable:$true] %s3307_s22 }
  0x1a   :  { %4041 = vmatpush3.bf16.msra.mxu0 %v4038_v10  ;;  %4045 = vmatpush3.bf16.msra.mxu1 %v4042_v11  ;;  %v640_v23 = vld [vmem:[#allocation5] sm:$0xff]  ;;  %v641_v24 = vld [vmem:[#allocation5 + $0x8] sm:$0xff]  ;;  %v642_v29 = vld [vmem:[#allocation5 + $0x10] sm:$0xff]  ;;  %s4354_s23 = scalar_lea.vmem %s3308_s22, 128  ;;  %p4359_p9 = scmp.lt.s32.totalorder %s3308_s22, %s3308_s22 }
  0x1b   :  { %4047 = vmatprep.subr.bf16.mxu0 %v4046_v12  ;;  %4051 = vmatprep.subr.bf16.mxu1 %v4050_v13  ;;  %v720_v25 = vld [vmem:[#allocation5 + $0x20] sm:$0xff]  ;;  %v721_v26 = vld [vmem:[#allocation5 + $0x28] sm:$0xff]  ;;  %v4545_v27 = vpack.c.bf16 %v641_v24, %v640_v23  ;;  %v643_v30 = vld [vmem:[#allocation5 + $0x18] sm:$0xff]  ;;  %p4355_p8 = scmp.ne.s32.totalorder %s3308_s22, %s4354_s23  ;;  %p4360_p10 = scmp.lt.s32.totalorder %s4354_s23, %s4354_s23 }
  0x1c   :  { %3626 = vmatprep.mubr.msk.f32.mxu0 %vm126_vm1, %v109_v14  ;;  %3642 = vmatprep.mubr.msk.f32.mxu1 %vm126_vm1, %v109_v14  ;;  %v4547_v28 = vpack.c.bf16 %v721_v26, %v720_v25  ;;  %v722_v31 = vld [vmem:[#allocation5 + $0x30] sm:$0xff]  ;;  %v723_v32 = vld [vmem:[#allocation5 + $0x38] sm:$0xff]  ;;  %v4555_v33 = vpack.c.bf16 %v643_v30, %v642_v29  ;;  %v797_v35 = vld [vmem:[#allocation5 + $0x40] sm:$0xff] }
  0x1d   :  { %3627 = vmatmul.mubr.msk.f32.vlgmr.msra.gmra.mrb[0].mxu0 %vm126_vm1, %v110_v15  ;;  %3643 = vmatmul.mubr.msk.f32.vlgmr.msra.gmra.mrb[0].mxu1 %vm126_vm1, %v110_v15  ;;  %v4557_v34 = vpack.c.bf16 %v723_v32, %v722_v31  ;;  %v798_v36 = vld [vmem:[#allocation5 + $0x48] sm:$0xff]  ;;  %v874_v37 = vld [vmem:[#allocation5 + $0x60] sm:$0xff]  ;;  %v637_v40 = vld [vmem:[#allocation2] sm:$0xff]  ;;  %p4361_p11 = por %p4360_p10, %p4359_p9 }
  0x1e   :  { %4049 = vmatpush3.bf16.msra.mxu0 %v4046_v12  ;;  %4053 = vmatpush3.bf16.msra.mxu1 %v4050_v13  ;;  %v875_v38 = vld [vmem:[#allocation5 + $0x68] sm:$0xff]  ;;  %v4579_v41 = vpack.c.bf16 %v798_v36, %v797_v35  ;;  %v799_v43 = vld [vmem:[#allocation5 + $0x50] sm:$0xff]  ;;  %v800_v44 = vld [vmem:[#allocation5 + $0x58] sm:$0xff] }
  0x1f   :  { %3629 = vmatprep.mubr.msk.f32.mxu0 %vm126_vm1, %v111_v16  ;;  %3645 = vmatprep.mubr.msk.f32.mxu1 %vm126_vm1, %v111_v16  ;;  %v4581_v42 = vpack.c.bf16 %v875_v38, %v874_v37  ;;  %v876_v45 = vld [vmem:[#allocation5 + $0x70] sm:$0xff]  ;;  %v877_v46 = vld [vmem:[#allocation5 + $0x78] sm:$0xff]  ;;  %v4587_v47 = vpack.c.bf16 %v800_v44, %v799_v43  ;;  %p4362_p12 = pnand %p4361_p11, %p4355_p8 }
  0x20   :  { %4054 = vmatprep.subr.bf16.mxu0 %v4407_v19  ;;  %4060 = vmatprep.subr.bf16.mxu1 %v4407_v19  ;;  %v4589_v48 = vpack.c.bf16 %v877_v46, %v876_v45  ;;  %v3342_v49 = vld [vmem:[%s4928_s3] ss:$0 sm:$0xff]  ;;  %v3352_v50 = vld [vmem:[%s4928_s3 + $0x1] ss:$0 sm:$0xff] }
  0x21   :  { %3630 = vmatmul.mubr.msk.f32.gmra.mrb[2].mxu0 %vm126_vm1, %v112_v17  ;;  %3646 = vmatmul.mubr.msk.f32.gmra.mrb[2].mxu1 %vm126_vm1, %v112_v17 }
  0x22   :  { %3632 = vmatprep.mubr.msk.f32.mxu0 %vm126_vm1, %v113_v18  ;;  %3648 = vmatprep.mubr.msk.f32.mxu1 %vm126_vm1, %v113_v18 }
  0x25   :  { %3633 = vmatmul.mubr.msk.f32.gmra.mrb[4].mxu0 %vm126_vm1, %v114_v20  ;;  %3649 = vmatmul.mubr.msk.f32.gmra.mrb[4].mxu1 %vm126_vm1, %v114_v20 }
  0x26   :  { %3635 = vmatprep.mubr.msk.f32.mxu0 %vm126_vm1, %v115_v21  ;;  %3651 = vmatprep.mubr.msk.f32.mxu1 %vm126_vm1, %v115_v21 }
  0x29   :  { %3636 = vmatmul.mubr.msk.f32.gmra.mrb[6].mxu0 %vm126_vm1, %v116_v22  ;;  %3652 = vmatmul.mubr.msk.f32.gmra.mrb[6].mxu1 %vm126_vm1, %v116_v22 }
  0x2a   :  { %3658 = vmatprep.mubr.msk.f32.mxu0 %vm126_vm1, %v109_v14  ;;  %3674 = vmatprep.mubr.msk.f32.mxu1 %vm126_vm1, %v109_v14 }
  0x2d   :  { %3659 = vmatmul.mubr.msk.f32.vlgmr.msra.gmra.mrb[8].mxu0 %vm126_vm1, %v110_v15  ;;  %3675 = vmatmul.mubr.msk.f32.vlgmr.msra.gmra.mrb[8].mxu1 %vm126_vm1, %v110_v15 }
  0x2e   :  { %4056 = vmatpush3.bf16.msra.mxu0 %v4545_v27  ;;  %4062 = vmatpush3.bf16.msra.mxu1 %v4547_v28 }
  0x2f   :  { %3661 = vmatprep.mubr.msk.f32.mxu0 %vm126_vm1, %v111_v16  ;;  %3677 = vmatprep.mubr.msk.f32.mxu1 %vm126_vm1, %v111_v16 }
  0x30   :  { %4057 = vmatprep.subr.bf16.mxu0 %v4407_v19  ;;  %4063 = vmatprep.subr.bf16.mxu1 %v4407_v19 }
  0x31   :  { %3662 = vmatmul.mubr.msk.f32.gmra.mrb[10].mxu0 %vm126_vm1, %v112_v17  ;;  %3678 = vmatmul.mubr.msk.f32.gmra.mrb[10].mxu1 %vm126_vm1, %v112_v17 }
  0x32   :  { %3664 = vmatprep.mubr.msk.f32.mxu0 %vm126_vm1, %v113_v18  ;;  %3680 = vmatprep.mubr.msk.f32.mxu1 %vm126_vm1, %v113_v18 }
  0x33   :  { %4059 = vmatpush3.bf16.msra.mxu0 %v4555_v33  ;;  %4065 = vmatpush3.bf16.msra.mxu1 %v4557_v34 }
  0x34   :  { %4066 = vmatprep.subr.bf16.mxu0 %v4407_v19  ;;  %4072 = vmatprep.subr.bf16.mxu1 %v4407_v19 }
  0x35   :  { %3665 = vmatmul.mubr.msk.f32.gmra.mrb[12].mxu0 %vm126_vm1, %v114_v20  ;;  %3681 = vmatmul.mubr.msk.f32.gmra.mrb[12].mxu1 %vm126_vm1, %v114_v20  ;;  %v3362_v20 = vld [vmem:[%s4928_s3 + $0x2] ss:$0 sm:$0xff] }
  0x36   :  { %3667 = vmatprep.mubr.msk.f32.mxu0 %vm126_vm1, %v115_v21  ;;  %3683 = vmatprep.mubr.msk.f32.mxu1 %vm126_vm1, %v115_v21  ;;  %v3372_v21 = vld [vmem:[%s4928_s3 + $0x3] ss:$0 sm:$0xff] }
  0x39   :  { %3668 = vmatmul.mubr.msk.f32.gmra.mrb[14].mxu0 %vm126_vm1, %v116_v22  ;;  %3684 = vmatmul.mubr.msk.f32.gmra.mrb[14].mxu1 %vm126_vm1, %v116_v22 }
  0x3a   :  { %3694 = vmatprep.mubr.msk.f32.mxu0 %vm4408_vm2, %v4409_v39  ;;  %3705 = vmatprep.mubr.msk.f32.mxu1 %vm4408_vm2, %v4409_v39 }
  0x3d   :  { %3695 = vmatmul.mubr.msk.f32.vlgmr.msra.gmra.mrb[16].mxu0 %vm97_vm0, %v637_v40  ;;  %3706 = vmatmul.mubr.msk.f32.vlgmr.msra.gmra.mrb[16].mxu1 %vm97_vm0, %v637_v40 }
  0x3e   :  { %4068 = vmatpush3.bf16.msra.mxu0 %v4579_v41  ;;  %4074 = vmatpush3.bf16.msra.mxu1 %v4581_v42 }
  0x3f   :  { %4069 = vmatprep.subr.bf16.mxu0 %v4407_v19  ;;  %4075 = vmatprep.subr.bf16.mxu1 %v4407_v19 }
  0x40   :  { %3716 = vmatprep.mubr.msk.f32.mxu0 %vm4408_vm2, %v4409_v39  ;;  %3727 = vmatprep.mubr.msk.f32.mxu1 %vm4408_vm2, %v4409_v39 }
  0x42   :  { %4071 = vmatpush3.bf16.msra.mxu0 %v4587_v47  ;;  %4077 = vmatpush3.bf16.msra.mxu1 %v4589_v48 }
  0x43   :  { %4078 = vmatprep.subr.bf16.mxu0 %v4407_v19  ;;  %4084 = vmatprep.subr.bf16.mxu1 %v4407_v19 }
  0x45   :  { %3717 = vmatmul.mubr.msk.f32.vlgmr.msra.gmra.mrb[18].mxu0 %vm97_vm0, %v637_v40  ;;  %3728 = vmatmul.mubr.msk.f32.vlgmr.msra.gmra.mrb[18].mxu1 %vm97_vm0, %v637_v40 }
  0x46   :  { %4080 = vmatpush3.bf16.msra.mxu0 %v4545_v27  ;;  %4086 = vmatpush3.bf16.msra.mxu1 %v4547_v28 }
  0x47   :  { %4081 = vmatprep.subr.bf16.mxu0 %v4407_v19  ;;  %4087 = vmatprep.subr.bf16.mxu1 %v4407_v19 }
  0x48   :  { %3738 = vmatprep.mubr.msk.f32.mxu0 %vm4408_vm2, %v4409_v39  ;;  %3749 = vmatprep.mubr.msk.f32.mxu1 %vm4408_vm2, %v4409_v39 }
  0x4a   :  { %4083 = vmatpush3.bf16.msra.mxu0 %v4555_v33  ;;  %4089 = vmatpush3.bf16.msra.mxu1 %v4557_v34 }
  0x4b   :  { %4090 = vmatprep.subr.bf16.mxu0 %v4407_v19  ;;  %4096 = vmatprep.subr.bf16.mxu1 %v4407_v19 }
  0xf0   :  { %v3628_v51 = vpop.f32.mrb[0].mxu0  ;;  %v3644_v52 = vpop.f32.mrb[0].mxu1 }
  0xf1   :  { %v223_v53 = vadd.f32 %v3628_v51, %v3342_v49  ;;  %v348_v54 = vadd.f32 %v3644_v52, %v3352_v50  ;;  %v217_v55 = vpop.f32.mrb[1].mxu0  ;;  %v342_v56 = vpop.f32.mrb[1].mxu1 }
  0xf2   :  { %v218_v57 = vadd.f32 %v3342_v49, %v217_v55  ;;  %v343_v58 = vadd.f32 %v3352_v50, %v342_v56 }
  0xf3   :  { %258 = vst.msk [vmem:[#allocation6 + $0x8] sm:$0xff] %vm97_vm0, %v223_v53  ;;  %382 = vst.msk [vmem:[#allocation7 + $0x8] sm:$0xff] %vm97_vm0, %v348_v54 }
  0xf4   :  { %257 = vst.msk [vmem:[#allocation6] sm:$0xff] %vm97_vm0, %v218_v57  ;;  %381 = vst.msk [vmem:[#allocation7] sm:$0xff] %vm97_vm0, %v343_v58  ;;  %v3631_v59 = vpop.f32.mrb[2].mxu0  ;;  %v3647_v60 = vpop.f32.mrb[2].mxu1 }
  0xf5   :  { %v233_v61 = vadd.f32 %v3631_v59, %v3342_v49  ;;  %v358_v62 = vadd.f32 %v3647_v60, %v3352_v50  ;;  %v227_v63 = vpop.f32.mrb[3].mxu0  ;;  %v352_v0 = vpop.f32.mrb[3].mxu1 }
  0xf6   :  { %v228_v1 = vadd.f32 %v3342_v49, %v227_v63  ;;  %v353_v2 = vadd.f32 %v3352_v50, %v352_v0 }
  0xf7   :  { %260 = vst.msk [vmem:[#allocation6 + $0x18] sm:$0xff] %vm97_vm0, %v233_v61  ;;  %384 = vst.msk [vmem:[#allocation7 + $0x18] sm:$0xff] %vm97_vm0, %v358_v62 }
  0xf8   :  { %259 = vst.msk [vmem:[#allocation6 + $0x10] sm:$0xff] %vm97_vm0, %v228_v1  ;;  %383 = vst.msk [vmem:[#allocation7 + $0x10] sm:$0xff] %vm97_vm0, %v353_v2  ;;  %v3634_v3 = vpop.f32.mrb[4].mxu0  ;;  %v3650_v4 = vpop.f32.mrb[4].mxu1 }
  0xf9   :  { %v243_v5 = vadd.f32 %v3634_v3, %v3342_v49  ;;  %v368_v6 = vadd.f32 %v3650_v4, %v3352_v50  ;;  %v237_v7 = vpop.f32.mrb[5].mxu0  ;;  %v362_v8 = vpop.f32.mrb[5].mxu1 }
  0xfa   :  { %v238_v9 = vadd.f32 %v3342_v49, %v237_v7  ;;  %v363_v10 = vadd.f32 %v3352_v50, %v362_v8 }
  0xfb   :  { %262 = vst.msk [vmem:[#allocation6 + $0x28] sm:$0xff] %vm97_vm0, %v243_v5  ;;  %386 = vst.msk [vmem:[#allocation7 + $0x28] sm:$0xff] %vm97_vm0, %v368_v6  ;;  %v639_v63 = vld [vmem:[#allocation6] sm:$0xff] }
  0xfc   :  { %261 = vst.msk [vmem:[#allocation6 + $0x20] sm:$0xff] %vm97_vm0, %v238_v9  ;;  %385 = vst.msk [vmem:[#allocation7 + $0x20] sm:$0xff] %vm97_vm0, %v363_v10  ;;  %v3637_v11 = vpop.f32.mrb[6].mxu0  ;;  %v3653_v12 = vpop.f32.mrb[6].mxu1  ;;  %v718_v1 = vld [vmem:[#allocation7] sm:$0xff] }
  0xfd   :  { %v253_v13 = vadd.f32 %v3637_v11, %v3342_v49  ;;  %v378_v14 = vadd.f32 %v3653_v12, %v3352_v50  ;;  %v247_v15 = vpop.f32.mrb[7].mxu0  ;;  %v372_v16 = vpop.f32.mrb[7].mxu1 }
  0xfe   :  { %v248_v17 = vadd.f32 %v3342_v49, %v247_v15  ;;  %v373_v18 = vadd.f32 %v3352_v50, %v372_v16 }
  0xff   :  { %264 = vst.msk [vmem:[#allocation6 + $0x38] sm:$0xff] %vm97_vm0, %v253_v13  ;;  %388 = vst.msk [vmem:[#allocation7 + $0x38] sm:$0xff] %vm97_vm0, %v378_v14 }
 0x100   :  { %263 = vst.msk [vmem:[#allocation6 + $0x30] sm:$0xff] %vm97_vm0, %v248_v17  ;;  %387 = vst.msk [vmem:[#allocation7 + $0x30] sm:$0xff] %vm97_vm0, %v373_v18  ;;  %v3660_v22 = vpop.f32.mrb[8].mxu0  ;;  %v3676_v23 = vpop.f32.mrb[8].mxu1 }
 0x101   :  { %v472_v24 = vadd.f32 %v3660_v22, %v3362_v20  ;;  %v596_v25 = vadd.f32 %v3676_v23, %v3372_v21  ;;  %v466_v26 = vpop.f32.mrb[9].mxu0  ;;  %v590_v29 = vpop.f32.mrb[9].mxu1 }
 0x102   :  { %v467_v30 = vadd.f32 %v3362_v20, %v466_v26  ;;  %v591_v31 = vadd.f32 %v3372_v21, %v590_v29 }
 0x103   :  { %506 = vst.msk [vmem:[#allocation8 + $0x8] sm:$0xff] %vm97_vm0, %v472_v24  ;;  %630 = vst.msk [vmem:[#allocation9 + $0x8] sm:$0xff] %vm97_vm0, %v596_v25  ;;  %v638_v24 = vld [vmem:[#allocation3] sm:$0xff] }
 0x104   :  { %505 = vst.msk [vmem:[#allocation8] sm:$0xff] %vm97_vm0, %v467_v30  ;;  %629 = vst.msk [vmem:[#allocation9] sm:$0xff] %vm97_vm0, %v591_v31  ;;  %v3663_v32 = vpop.f32.mrb[10].mxu0  ;;  %v3679_v35 = vpop.f32.mrb[10].mxu1 }
 0x105   :  { %v482_v36 = vadd.f32 %v3663_v32, %v3362_v20  ;;  %v606_v37 = vadd.f32 %v3679_v35, %v3372_v21  ;;  %v476_v38 = vpop.f32.mrb[11].mxu0  ;;  %v600_v40 = vpop.f32.mrb[11].mxu1 }
 0x106   :  { %v477_v43 = vadd.f32 %v3362_v20, %v476_v38  ;;  %v601_v44 = vadd.f32 %v3372_v21, %v600_v40  ;;  %v969_v40 = vld [vmem:[#allocation6 + $0x8] sm:$0xff] }
 0x107   :  { %508 = vst.msk [vmem:[#allocation8 + $0x18] sm:$0xff] %vm97_vm0, %v482_v36  ;;  %632 = vst.msk [vmem:[#allocation9 + $0x18] sm:$0xff] %vm97_vm0, %v606_v37 }
 0x108   :  { %507 = vst.msk [vmem:[#allocation8 + $0x10] sm:$0xff] %vm97_vm0, %v477_v43  ;;  %631 = vst.msk [vmem:[#allocation9 + $0x10] sm:$0xff] %vm97_vm0, %v601_v44  ;;  %v3666_v45 = vpop.f32.mrb[12].mxu0  ;;  %v3682_v46 = vpop.f32.mrb[12].mxu1  ;;  %v1049_v44 = vld [vmem:[#allocation7 + $0x8] sm:$0xff] }
 0x109   :  { %v492_v49 = vadd.f32 %v3666_v45, %v3362_v20  ;;  %v616_v50 = vadd.f32 %v3682_v46, %v3372_v21  ;;  %v486_v51 = vpop.f32.mrb[13].mxu0  ;;  %v610_v52 = vpop.f32.mrb[13].mxu1 }
 0x10a   :  { %v487_v53 = vadd.f32 %v3362_v20, %v486_v51  ;;  %v611_v54 = vadd.f32 %v3372_v21, %v610_v52 }
 0x10b   :  { %510 = vst.msk [vmem:[#allocation8 + $0x28] sm:$0xff] %vm97_vm0, %v492_v49  ;;  %634 = vst.msk [vmem:[#allocation9 + $0x28] sm:$0xff] %vm97_vm0, %v616_v50  ;;  %v795_v9 = vld [vmem:[#allocation8] sm:$0xff] }
 0x10c   :  { %509 = vst.msk [vmem:[#allocation8 + $0x20] sm:$0xff] %vm97_vm0, %v487_v53  ;;  %633 = vst.msk [vmem:[#allocation9 + $0x20] sm:$0xff] %vm97_vm0, %v611_v54  ;;  %v3669_v55 = vpop.f32.mrb[14].mxu0  ;;  %v3685_v56 = vpop.f32.mrb[14].mxu1  ;;  %v872_v13 = vld [vmem:[#allocation9] sm:$0xff]  ;;  %v1126_v54 = vld [vmem:[#allocation8 + $0x8] sm:$0xff] }
 0x10d   :  { %v502_v57 = vadd.f32 %v3669_v55, %v3362_v20  ;;  %v626_v58 = vadd.f32 %v3685_v56, %v3372_v21  ;;  %v496_v59 = vpop.f32.mrb[15].mxu0  ;;  %v620_v60 = vpop.f32.mrb[15].mxu1 }
 0x10e   :  { %v497_v61 = vadd.f32 %v3362_v20, %v496_v59  ;;  %v621_v62 = vadd.f32 %v3372_v21, %v620_v60 }
 0x10f   :  { %512 = vst.msk [vmem:[#allocation8 + $0x38] sm:$0xff] %vm97_vm0, %v502_v57  ;;  %636 = vst.msk [vmem:[#allocation9 + $0x38] sm:$0xff] %vm97_vm0, %v626_v58  ;;  %v1203_v58 = vld [vmem:[#allocation9 + $0x8] sm:$0xff] }
 0x110   :  { %511 = vst.msk [vmem:[#allocation8 + $0x30] sm:$0xff] %vm97_vm0, %v497_v61  ;;  %635 = vst.msk [vmem:[#allocation9 + $0x30] sm:$0xff] %vm97_vm0, %v621_v62  ;;  %v713_v0 = vpop.f32.mrb[16].mxu0  ;;  %v790_v2 = vpop.f32.mrb[16].mxu1 }
 0x111   :  { %v717_v3 = vadd.f32 %v713_v0, %v639_v63  ;;  %v794_v4 = vadd.f32 %v790_v2, %v718_v1  ;;  %v3696_v5 = vpop.f32.mrb[17].mxu0  ;;  %v3707_v6 = vpop.f32.mrb[17].mxu1 }
 0x113   :  { %v949_v7 = vmul.f32 0.5, %v717_v3  ;;  %v953_v8 = vmul.f32 0.5, %v794_v4 }
 0x115   :  { %4252 = vtanh.f32 %v949_v7 }
 0x116   :  { %4254 = vtanh.f32 %v953_v8 }
 0x118   :  { %v867_v10 = vpop.f32.mrb[18].mxu0  ;;  %v944_v11 = vpop.f32.mrb[18].mxu1 }
 0x119   :  { %v871_v12 = vadd.f32 %v867_v10, %v795_v9  ;;  %v3718_v14 = vpop.f32.mrb[19].mxu0  ;;  %v3729_v15 = vpop.f32.mrb[19].mxu1  ;;  %v948_v16 = vadd.f32 %v944_v11, %v872_v13 }
 0x11a   :  { %v1300_v14 = vld [vmem:[#allocation6 + $0x10] sm:$0xff] }
 0x11b   :  { %4256 = vtanh.f32 %v871_v12  ;;  %v958_v17 = vmul.f32 0.5, %v948_v16  ;;  %v1380_v16 = vld [vmem:[#allocation7 + $0x10] sm:$0xff] }
 0x11d   :  { %4258 = vtanh.f32 %v958_v17 }
 0x11f   :  { %v4253_v18 = vpop.eup %4252 }
 0x120   :  { %v4255_v20 = vpop.eup %4254  ;;  %v951_v21 = vmul.f32 0.5, %v4253_v18 }
 0x121   :  { %v955_v22 = vmul.f32 0.5, %v4255_v20 }
 0x122   :  { %v952_v23 = vadd.f32 0.5, %v951_v21 }
 0x123   :  { %v956_v25 = vadd.f32 0.5, %v955_v22 }
 0x125   :  { %v4257_v26 = vpop.eup %4256  ;;  %v962_v29 = vmul.f32 %v956_v25, %v638_v24  ;;  %v1457_v25 = vld [vmem:[#allocation8 + $0x10] sm:$0xff] }
 0x126   :  { %v963_v30 = vmul.f32 %v4257_v26, %v952_v23 }
 0x127   :  { %v4259_v32 = vpop.eup %4258 }
 0x128   :  { %v964_v31 = vadd.f32 %v963_v30, %v962_v29  ;;  %v960_v35 = vmul.f32 0.5, %v4259_v32 }
 0x12a   :  { %4260 = vtanh.f32 %v964_v31  ;;  %v961_v36 = vadd.f32 0.5, %v960_v35 }
 0x134   :  { %v4261_v37 = vpop.eup %4260 }
 0x135   :  { %v966_v38 = vmul.f32 %v4261_v37, %v961_v36 }
 0x137   :  { %967 = vst.msk [vmem:[%s4931_s6] sm:$0xff] %vm97_vm0, %v966_v38  ;;  %3739 = vmatmul.mubr.msk.f32.vlgmr.msra.gmra.mrb[20].mxu0 %vm97_vm0, %v966_v38  ;;  %3750 = vmatmul.mubr.msk.f32.vlgmr.msra.gmra.mrb[20].mxu1 %vm97_vm0, %v966_v38 }
 0x138   :  { %4092 = vmatpush3.bf16.msra.mxu0 %v4579_v41  ;;  %4098 = vmatpush3.bf16.msra.mxu1 %v4581_v42 }
 0x139   :  { %4093 = vmatprep.subr.bf16.mxu0 %v4407_v19  ;;  %4099 = vmatprep.subr.bf16.mxu1 %v4407_v19 }
 0x13a   :  { %3760 = vmatprep.mubr.msk.f32.mxu0 %vm4408_vm2, %v4409_v39  ;;  %3771 = vmatprep.mubr.msk.f32.mxu1 %vm4408_vm2, %v4409_v39 }
 0x13c   :  { %4095 = vmatpush3.bf16.msra.mxu0 %v4587_v47  ;;  %4101 = vmatpush3.bf16.msra.mxu1 %v4589_v48 }
 0x13d   :  { %4102 = vmatprep.subr.bf16.mxu0 %v4407_v19  ;;  %4108 = vmatprep.subr.bf16.mxu1 %v4407_v19 }
 0x13f   :  { %3761 = vmatmul.mubr.msk.f32.vlgmr.msra.gmra.mrb[22].mxu0 %vm97_vm0, %v966_v38  ;;  %3772 = vmatmul.mubr.msk.f32.vlgmr.msra.gmra.mrb[22].mxu1 %vm97_vm0, %v966_v38 }
 0x140   :  { %4104 = vmatpush3.bf16.msra.mxu0 %v4545_v27  ;;  %4110 = vmatpush3.bf16.msra.mxu1 %v4547_v28 }
 0x141   :  { %4105 = vmatprep.subr.bf16.mxu0 %v4407_v19  ;;  %4111 = vmatprep.subr.bf16.mxu1 %v4407_v19 }
 0x142   :  { %3782 = vmatprep.mubr.msk.f32.mxu0 %vm4408_vm2, %v4409_v39  ;;  %3793 = vmatprep.mubr.msk.f32.mxu1 %vm4408_vm2, %v4409_v39 }
 0x144   :  { %4107 = vmatpush3.bf16.msra.mxu0 %v4555_v33  ;;  %4113 = vmatpush3.bf16.msra.mxu1 %v4557_v34 }
 0x145   :  { %4114 = vmatprep.subr.bf16.mxu0 %v4407_v19  ;;  %4120 = vmatprep.subr.bf16.mxu1 %v4407_v19 }
 0x20a   :  { %v1043_v43 = vpop.f32.mrb[20].mxu0  ;;  %v1120_v45 = vpop.f32.mrb[20].mxu1 }
 0x20b   :  { %v1047_v46 = vadd.f32 %v1043_v43, %v969_v40  ;;  %v1124_v49 = vadd.f32 %v1120_v45, %v1049_v44  ;;  %v3740_v50 = vpop.f32.mrb[21].mxu0  ;;  %v3751_v51 = vpop.f32.mrb[21].mxu1 }
 0x20d   :  { %v1279_v52 = vmul.f32 0.5, %v1047_v46  ;;  %v1283_v53 = vmul.f32 0.5, %v1124_v49 }
 0x20f   :  { %4262 = vtanh.f32 %v1279_v52 }
 0x210   :  { %4264 = vtanh.f32 %v1283_v53 }
 0x212   :  { %v1197_v55 = vpop.f32.mrb[22].mxu0  ;;  %v1274_v56 = vpop.f32.mrb[22].mxu1 }
 0x213   :  { %v1201_v57 = vadd.f32 %v1197_v55, %v1126_v54  ;;  %v3762_v59 = vpop.f32.mrb[23].mxu0  ;;  %v3773_v60 = vpop.f32.mrb[23].mxu1  ;;  %v1278_v61 = vadd.f32 %v1274_v56, %v1203_v58  ;;  %v1711_v58 = vld [vmem:[#allocation7 + $0x18] sm:$0xff] }
 0x215   :  { %4266 = vtanh.f32 %v1201_v57  ;;  %v1288_v62 = vmul.f32 0.5, %v1278_v61 }
 0x217   :  { %4268 = vtanh.f32 %v1288_v62 }
 0x219   :  { %v4263_v63 = vpop.eup %4262 }
 0x21a   :  { %v4265_v0 = vpop.eup %4264  ;;  %v1281_v1 = vmul.f32 0.5, %v4263_v63 }
 0x21b   :  { %v1285_v2 = vmul.f32 0.5, %v4265_v0 }
 0x21c   :  { %v1282_v3 = vadd.f32 0.5, %v1281_v1 }
 0x21d   :  { %v1286_v4 = vadd.f32 0.5, %v1285_v2  ;;  %v1788_v2 = vld [vmem:[#allocation8 + $0x18] sm:$0xff] }
 0x21f   :  { %v4267_v5 = vpop.eup %4266  ;;  %v1292_v6 = vmul.f32 %v1286_v4, %v964_v31  ;;  %v1534_v31 = vld [vmem:[#allocation9 + $0x10] sm:$0xff]  ;;  %v1865_v4 = vld [vmem:[#allocation9 + $0x18] sm:$0xff] }
 0x220   :  { %v1293_v7 = vmul.f32 %v4267_v5, %v1282_v3 }
 0x221   :  { %v4269_v9 = vpop.eup %4268 }
 0x222   :  { %v1294_v8 = vadd.f32 %v1293_v7, %v1292_v6  ;;  %v1290_v10 = vmul.f32 0.5, %v4269_v9 }
 0x224   :  { %4270 = vtanh.f32 %v1294_v8  ;;  %v1291_v11 = vadd.f32 0.5, %v1290_v10 }
 0x22e   :  { %v4271_v12 = vpop.eup %4270 }
 0x22f   :  { %v1296_v13 = vmul.f32 %v4271_v12, %v1291_v11 }
 0x231   :  { %3389 = vst.msk [vmem:[%s4931_s6 + $0x8] sm:$0xff] %vm97_vm0, %v1296_v13  ;;  %3783 = vmatmul.mubr.msk.f32.vlgmr.msra.gmra.mrb[24].mxu0 %vm97_vm0, %v1296_v13  ;;  %3794 = vmatmul.mubr.msk.f32.vlgmr.msra.gmra.mrb[24].mxu1 %vm97_vm0, %v1296_v13 }
 0x232   :  { %4116 = vmatpush3.bf16.msra.mxu0 %v4579_v41  ;;  %4122 = vmatpush3.bf16.msra.mxu1 %v4581_v42 }
 0x233   :  { %4117 = vmatprep.subr.bf16.mxu0 %v4407_v19  ;;  %4123 = vmatprep.subr.bf16.mxu1 %v4407_v19 }
 0x234   :  { %3804 = vmatprep.mubr.msk.f32.mxu0 %vm4408_vm2, %v4409_v39  ;;  %3815 = vmatprep.mubr.msk.f32.mxu1 %vm4408_vm2, %v4409_v39 }
 0x236   :  { %4119 = vmatpush3.bf16.msra.mxu0 %v4587_v47  ;;  %4125 = vmatpush3.bf16.msra.mxu1 %v4589_v48 }
 0x237   :  { %4126 = vmatprep.subr.bf16.mxu0 %v4407_v19  ;;  %4132 = vmatprep.subr.bf16.mxu1 %v4407_v19 }
 0x239   :  { %3805 = vmatmul.mubr.msk.f32.vlgmr.msra.gmra.mrb[26].mxu0 %vm97_vm0, %v1296_v13  ;;  %3816 = vmatmul.mubr.msk.f32.vlgmr.msra.gmra.mrb[26].mxu1 %vm97_vm0, %v1296_v13 }
 0x23a   :  { %4128 = vmatpush3.bf16.msra.mxu0 %v4545_v27  ;;  %4134 = vmatpush3.bf16.msra.mxu1 %v4547_v28 }
 0x23b   :  { %4129 = vmatprep.subr.bf16.mxu0 %v4407_v19  ;;  %4135 = vmatprep.subr.bf16.mxu1 %v4407_v19 }
 0x23c   :  { %3826 = vmatprep.mubr.msk.f32.mxu0 %vm4408_vm2, %v4409_v39  ;;  %3837 = vmatprep.mubr.msk.f32.mxu1 %vm4408_vm2, %v4409_v39 }
 0x23e   :  { %4131 = vmatpush3.bf16.msra.mxu0 %v4555_v33  ;;  %4137 = vmatpush3.bf16.msra.mxu1 %v4557_v34 }
 0x23f   :  { %4138 = vmatprep.subr.bf16.mxu0 %v4407_v19  ;;  %4144 = vmatprep.subr.bf16.mxu1 %v4407_v19 }
 0x304   :  { %v1374_v15 = vpop.f32.mrb[24].mxu0  ;;  %v1451_v17 = vpop.f32.mrb[24].mxu1 }
 0x305   :  { %v1378_v18 = vadd.f32 %v1374_v15, %v1300_v14  ;;  %v1455_v20 = vadd.f32 %v1451_v17, %v1380_v16  ;;  %v3784_v21 = vpop.f32.mrb[25].mxu0  ;;  %v3795_v22 = vpop.f32.mrb[25].mxu1 }
 0x307   :  { %v1610_v23 = vmul.f32 0.5, %v1378_v18  ;;  %v1614_v24 = vmul.f32 0.5, %v1455_v20 }
 0x309   :  { %4272 = vtanh.f32 %v1610_v23 }
 0x30a   :  { %4274 = vtanh.f32 %v1614_v24 }
 0x30c   :  { %v1528_v26 = vpop.f32.mrb[26].mxu0  ;;  %v1605_v29 = vpop.f32.mrb[26].mxu1 }
 0x30d   :  { %v1532_v30 = vadd.f32 %v1528_v26, %v1457_v25  ;;  %v3806_v32 = vpop.f32.mrb[27].mxu0  ;;  %v3817_v35 = vpop.f32.mrb[27].mxu1  ;;  %v1609_v36 = vadd.f32 %v1605_v29, %v1534_v31  ;;  %v2374_v25 = vld [vmem:[#allocation5 + $0x20] sm:$0xff]  ;;  %v2296_v29 = vld [vmem:[#allocation5 + $0x10] sm:$0xff] }
 0x30e   :  { %v2376_v31 = vld [vmem:[#allocation5 + $0x30] sm:$0xff]  ;;  %v2377_v35 = vld [vmem:[#allocation5 + $0x38] sm:$0xff] }
 0x30f   :  { %4276 = vtanh.f32 %v1532_v30  ;;  %v1619_v37 = vmul.f32 0.5, %v1609_v36  ;;  %v2297_v30 = vld [vmem:[#allocation5 + $0x18] sm:$0xff]  ;;  %v4792_v36 = vpack.c.bf16 %v2377_v35, %v2376_v31  ;;  %v2450_v31 = vld [vmem:[#allocation8 + $0x28] sm:$0xff] }
 0x310   :  { %v4790_v32 = vpack.c.bf16 %v2297_v30, %v2296_v29 }
 0x311   :  { %4278 = vtanh.f32 %v1619_v37  ;;  %v1962_v37 = vld [vmem:[#allocation6 + $0x20] sm:$0xff] }
 0x313   :  { %v4273_v38 = vpop.eup %4272 }
 0x314   :  { %v4275_v40 = vpop.eup %4274  ;;  %v1612_v43 = vmul.f32 0.5, %v4273_v38 }
 0x315   :  { %v1616_v44 = vmul.f32 0.5, %v4275_v40  ;;  %v2042_v40 = vld [vmem:[#allocation7 + $0x20] sm:$0xff] }
 0x316   :  { %v1613_v45 = vadd.f32 0.5, %v1612_v43 }
 0x317   :  { %v1617_v46 = vadd.f32 0.5, %v1616_v44 }
 0x319   :  { %v4277_v49 = vpop.eup %4276  ;;  %v1623_v50 = vmul.f32 %v1617_v46, %v1294_v8 }
 0x31a   :  { %v1624_v51 = vmul.f32 %v4277_v49, %v1613_v45 }
 0x31b   :  { %v4279_v53 = vpop.eup %4278 }
 0x31c   :  { %v1625_v52 = vadd.f32 %v1624_v51, %v1623_v50  ;;  %v1621_v54 = vmul.f32 0.5, %v4279_v53 }
 0x31e   :  { %4280 = vtanh.f32 %v1625_v52  ;;  %v1622_v55 = vadd.f32 0.5, %v1621_v54 }
 0x328   :  { %v4281_v56 = vpop.eup %4280 }
 0x329   :  { %v1627_v57 = vmul.f32 %v4281_v56, %v1622_v55  ;;  %v2196_v56 = vld [vmem:[#allocation9 + $0x20] sm:$0xff] }
 0x32b   :  { %3394 = vst.msk [vmem:[%s4931_s6 + $0x10] sm:$0xff] %vm97_vm0, %v1627_v57  ;;  %3827 = vmatmul.mubr.msk.f32.vlgmr.msra.gmra.mrb[28].mxu0 %vm97_vm0, %v1627_v57  ;;  %3838 = vmatmul.mubr.msk.f32.vlgmr.msra.gmra.mrb[28].mxu1 %vm97_vm0, %v1627_v57 }
 0x32c   :  { %4140 = vmatpush3.bf16.msra.mxu0 %v4579_v41  ;;  %4146 = vmatpush3.bf16.msra.mxu1 %v4581_v42 }
 0x32d   :  { %4141 = vmatprep.subr.bf16.mxu0 %v4407_v19  ;;  %4147 = vmatprep.subr.bf16.mxu1 %v4407_v19 }
 0x32e   :  { %3848 = vmatprep.mubr.msk.f32.mxu0 %vm4408_vm2, %v4409_v39  ;;  %3859 = vmatprep.mubr.msk.f32.mxu1 %vm4408_vm2, %v4409_v39 }
 0x330   :  { %4143 = vmatpush3.bf16.msra.mxu0 %v4587_v47  ;;  %4149 = vmatpush3.bf16.msra.mxu1 %v4589_v48 }
 0x331   :  { %4150 = vmatprep.subr.bf16.mxu0 %v4407_v19  ;;  %4156 = vmatprep.subr.bf16.mxu1 %v4407_v19 }
 0x333   :  { %3849 = vmatmul.mubr.msk.f32.vlgmr.msra.gmra.mrb[30].mxu0 %vm97_vm0, %v1627_v57  ;;  %3860 = vmatmul.mubr.msk.f32.vlgmr.msra.gmra.mrb[30].mxu1 %vm97_vm0, %v1627_v57 }
 0x334   :  { %4152 = vmatpush3.bf16.msra.mxu0 %v4545_v27  ;;  %4158 = vmatpush3.bf16.msra.mxu1 %v4547_v28  ;;  %v1631_v27 = vld [vmem:[#allocation6 + $0x18] sm:$0xff] }
 0x335   :  { %4153 = vmatprep.subr.bf16.mxu0 %v4407_v19  ;;  %4159 = vmatprep.subr.bf16.mxu1 %v4407_v19 }
 0x336   :  { %3870 = vmatprep.mubr.msk.f32.mxu0 %vm4408_vm2, %v4409_v39  ;;  %3881 = vmatprep.mubr.msk.f32.mxu1 %vm4408_vm2, %v4409_v39 }
 0x338   :  { %4155 = vmatpush3.bf16.msra.mxu0 %v4555_v33  ;;  %4161 = vmatpush3.bf16.msra.mxu1 %v4557_v34 }
 0x339   :  { %4162 = vmatprep.subr.bf16.mxu0 %v4407_v19  ;;  %4168 = vmatprep.subr.bf16.mxu1 %v4407_v19 }
 0x3fe   :  { %v1705_v28 = vpop.f32.mrb[28].mxu0  ;;  %v1782_v59 = vpop.f32.mrb[28].mxu1 }
 0x3ff   :  { %v1709_v60 = vadd.f32 %v1705_v28, %v1631_v27  ;;  %v1786_v61 = vadd.f32 %v1782_v59, %v1711_v58  ;;  %v3828_v62 = vpop.f32.mrb[29].mxu0  ;;  %v3839_v63 = vpop.f32.mrb[29].mxu1 }
 0x401   :  { %v1941_v0 = vmul.f32 0.5, %v1709_v60  ;;  %v1945_v1 = vmul.f32 0.5, %v1786_v61 }
 0x403   :  { %4282 = vtanh.f32 %v1941_v0 }
 0x404   :  { %4284 = vtanh.f32 %v1945_v1 }
 0x406   :  { %v1859_v33 = vpop.f32.mrb[30].mxu0  ;;  %v1936_v3 = vpop.f32.mrb[30].mxu1 }
 0x407   :  { %v1863_v34 = vadd.f32 %v1859_v33, %v1788_v2  ;;  %v3850_v5 = vpop.f32.mrb[31].mxu0  ;;  %v3861_v6 = vpop.f32.mrb[31].mxu1  ;;  %v1940_v7 = vadd.f32 %v1936_v3, %v1865_v4 }
 0x408   :  { %v2451_v5 = vld [vmem:[#allocation5 + $0x40] sm:$0xff]  ;;  %v2452_v6 = vld [vmem:[#allocation5 + $0x48] sm:$0xff] }
 0x409   :  { %4286 = vtanh.f32 %v1863_v34  ;;  %v1950_v8 = vmul.f32 0.5, %v1940_v7  ;;  %v2528_v7 = vld [vmem:[#allocation5 + $0x60] sm:$0xff] }
 0x40b   :  { %4288 = vtanh.f32 %v1950_v8  ;;  %v2529_v8 = vld [vmem:[#allocation5 + $0x68] sm:$0xff] }
 0x40d   :  { %v4283_v9 = vpop.eup %4282 }
 0x40e   :  { %v4285_v10 = vpop.eup %4284  ;;  %v1943_v11 = vmul.f32 0.5, %v4283_v9 }
 0x40f   :  { %v1947_v12 = vmul.f32 0.5, %v4285_v10 }
 0x410   :  { %v1944_v13 = vadd.f32 0.5, %v1943_v11  ;;  %v4802_v11 = vpack.c.bf16 %v2452_v6, %v2451_v5  ;;  %v2858_v6 = vld [vmem:[#allocation9 + $0x30] sm:$0xff] }
 0x411   :  { %v1948_v14 = vadd.f32 0.5, %v1947_v12  ;;  %v4804_v12 = vpack.c.bf16 %v2529_v8, %v2528_v7 }
 0x413   :  { %v4287_v15 = vpop.eup %4286  ;;  %v1954_v16 = vmul.f32 %v1948_v14, %v1625_v52  ;;  %v2119_v52 = vld [vmem:[#allocation8 + $0x20] sm:$0xff] }
 0x414   :  { %v1955_v17 = vmul.f32 %v4287_v15, %v1944_v13  ;;  %v2453_v13 = vld [vmem:[#allocation5 + $0x50] sm:$0xff]  ;;  %v2454_v15 = vld [vmem:[#allocation5 + $0x58] sm:$0xff] }
 0x415   :  { %v4289_v20 = vpop.eup %4288 }
 0x416   :  { %v4755_v18 = vadd.f32 %v1955_v17, %v1954_v16  ;;  %v1952_v21 = vmul.f32 0.5, %v4289_v20  ;;  %v2530_v16 = vld [vmem:[#allocation5 + $0x70] sm:$0xff]  ;;  %v2531_v17 = vld [vmem:[#allocation5 + $0x78] sm:$0xff] }
 0x417   :  { %v4816_v20 = vpack.c.bf16 %v2531_v17, %v2530_v16 }
 0x418   :  { %4290 = vtanh.f32 %v4755_v18  ;;  %v1953_v22 = vadd.f32 0.5, %v1952_v21  ;;  %v2293_v21 = vld [vmem:[#allocation6 + $0x28] sm:$0xff] }
 0x422   :  { %v4291_v23 = vpop.eup %4290 }
 0x423   :  { %v1958_v24 = vmul.f32 %v4291_v23, %v1953_v22  ;;  %v2373_v23 = vld [vmem:[#allocation7 + $0x28] sm:$0xff] }
 0x425   :  { %3399 = vst.msk [vmem:[%s4931_s6 + $0x18] sm:$0xff] %vm97_vm0, %v1958_v24  ;;  %3871 = vmatmul.mubr.msk.f32.vlgmr.msra.gmra.mrb[32].mxu0 %vm97_vm0, %v1958_v24  ;;  %3882 = vmatmul.mubr.msk.f32.vlgmr.msra.gmra.mrb[32].mxu1 %vm97_vm0, %v1958_v24 }
 0x426   :  { %4164 = vmatpush3.bf16.msra.mxu0 %v4579_v41  ;;  %4170 = vmatpush3.bf16.msra.mxu1 %v4581_v42  ;;  %v2294_v41 = vld [vmem:[#allocation5] sm:$0xff]  ;;  %v2295_v42 = vld [vmem:[#allocation5 + $0x8] sm:$0xff] }
 0x427   :  { %4165 = vmatprep.subr.bf16.mxu0 %v4407_v19  ;;  %4171 = vmatprep.subr.bf16.mxu1 %v4407_v19 }
 0x428   :  { %3892 = vmatprep.mubr.msk.f32.mxu0 %vm4408_vm2, %v4409_v39  ;;  %3903 = vmatprep.mubr.msk.f32.mxu1 %vm4408_vm2, %v4409_v39 }
 0x42a   :  { %4167 = vmatpush3.bf16.msra.mxu0 %v4587_v47  ;;  %4173 = vmatpush3.bf16.msra.mxu1 %v4589_v48  ;;  %v4782_v47 = vpack.c.bf16 %v2295_v42, %v2294_v41  ;;  %v2375_v48 = vld [vmem:[#allocation5 + $0x28] sm:$0xff] }
 0x42b   :  { %4174 = vmatprep.subr.bf16.mxu0 %v4407_v19  ;;  %4180 = vmatprep.subr.bf16.mxu1 %v4407_v19  ;;  %v4784_v26 = vpack.c.bf16 %v2375_v48, %v2374_v25 }
 0x42d   :  { %3893 = vmatmul.mubr.msk.f32.vlgmr.msra.gmra.mrb[34].mxu0 %vm97_vm0, %v1958_v24  ;;  %3904 = vmatmul.mubr.msk.f32.vlgmr.msra.gmra.mrb[34].mxu1 %vm97_vm0, %v1958_v24 }
 0x42e   :  { %3914 = vmatprep.mubr.msk.f32.mxu0 %vm4408_vm2, %v4409_v39  ;;  %3925 = vmatprep.mubr.msk.f32.mxu1 %vm4408_vm2, %v4409_v39 }
 0x42f   :  { %4176 = vmatpush3.bf16.msra.mxu0 %v4782_v47  ;;  %4182 = vmatpush3.bf16.msra.mxu1 %v4784_v26 }
 0x430   :  { %4177 = vmatprep.subr.bf16.mxu0 %v4407_v19  ;;  %4183 = vmatprep.subr.bf16.mxu1 %v4407_v19 }
 0x433   :  { %4179 = vmatpush3.bf16.msra.mxu0 %v4790_v32  ;;  %4185 = vmatpush3.bf16.msra.mxu1 %v4792_v36 }
 0x434   :  { %4186 = vmatprep.subr.bf16.mxu0 %v4407_v19  ;;  %4192 = vmatprep.subr.bf16.mxu1 %v4407_v19 }
 0x4f8   :  { %v2036_v38 = vpop.f32.mrb[32].mxu0  ;;  %v2113_v43 = vpop.f32.mrb[32].mxu1 }
 0x4f9   :  { %v2040_v44 = vadd.f32 %v2036_v38, %v1962_v37  ;;  %v2117_v45 = vadd.f32 %v2113_v43, %v2042_v40  ;;  %v3872_v46 = vpop.f32.mrb[33].mxu0  ;;  %v3883_v49 = vpop.f32.mrb[33].mxu1  ;;  %v2527_v40 = vld [vmem:[#allocation9 + $0x28] sm:$0xff] }
 0x4fb   :  { %v2272_v50 = vmul.f32 0.5, %v2040_v44  ;;  %v2276_v51 = vmul.f32 0.5, %v2117_v45 }
 0x4fd   :  { %4292 = vtanh.f32 %v2272_v50 }
 0x4fe   :  { %4294 = vtanh.f32 %v2276_v51 }
 0x500   :  { %v2190_v53 = vpop.f32.mrb[34].mxu0  ;;  %v2267_v54 = vpop.f32.mrb[34].mxu1 }
 0x501   :  { %v2194_v55 = vadd.f32 %v2190_v53, %v2119_v52  ;;  %v3894_v57 = vpop.f32.mrb[35].mxu0  ;;  %v3905_v27 = vpop.f32.mrb[35].mxu1  ;;  %v2271_v28 = vadd.f32 %v2267_v54, %v2196_v56 }
 0x503   :  { %4296 = vtanh.f32 %v2194_v55  ;;  %v2281_v58 = vmul.f32 0.5, %v2271_v28 }
 0x505   :  { %4298 = vtanh.f32 %v2281_v58 }
 0x507   :  { %v4293_v59 = vpop.eup %4292 }
 0x508   :  { %v4295_v60 = vpop.eup %4294  ;;  %v2274_v61 = vmul.f32 0.5, %v4293_v59 }
 0x509   :  { %v2278_v62 = vmul.f32 0.5, %v4295_v60 }
 0x50a   :  { %v2275_v63 = vadd.f32 0.5, %v2274_v61 }
 0x50b   :  { %v2279_v0 = vadd.f32 0.5, %v2278_v62  ;;  %v2704_v62 = vld [vmem:[#allocation7 + $0x30] sm:$0xff] }
 0x50d   :  { %v4297_v1 = vpop.eup %4296  ;;  %v2285_v2 = vmul.f32 %v2279_v0, %v4755_v18  ;;  %v4814_v18 = vpack.c.bf16 %v2454_v15, %v2453_v13 }
 0x50e   :  { %v2286_v33 = vmul.f32 %v4297_v1, %v2275_v63 }
 0x50f   :  { %v4299_v34 = vpop.eup %4298 }
 0x510   :  { %v4799_v3 = vadd.f32 %v2286_v33, %v2285_v2  ;;  %v2283_v4 = vmul.f32 0.5, %v4299_v34 }
 0x512   :  { %4300 = vtanh.f32 %v4799_v3  ;;  %v2284_v9 = vadd.f32 0.5, %v2283_v4  ;;  %v2781_v4 = vld [vmem:[#allocation8 + $0x30] sm:$0xff] }
 0x51c   :  { %v4301_v10 = vpop.eup %4300 }
 0x51d   :  { %v2289_v14 = vmul.f32 %v4301_v10, %v2284_v9 }
 0x51f   :  { %3404 = vst.msk [vmem:[%s4931_s6 + $0x20] sm:$0xff] %vm97_vm0, %v2289_v14  ;;  %3915 = vmatmul.mubr.msk.f32.vlgmr.msra.gmra.mrb[36].mxu0 %vm97_vm0, %v2289_v14  ;;  %3926 = vmatmul.mubr.msk.f32.vlgmr.msra.gmra.mrb[36].mxu1 %vm97_vm0, %v2289_v14 }
 0x520   :  { %4188 = vmatpush3.bf16.msra.mxu0 %v4802_v11  ;;  %4194 = vmatpush3.bf16.msra.mxu1 %v4804_v12 }
 0x521   :  { %4189 = vmatprep.subr.bf16.mxu0 %v4407_v19  ;;  %4195 = vmatprep.subr.bf16.mxu1 %v4407_v19 }
 0x522   :  { %3936 = vmatprep.mubr.msk.f32.mxu0 %vm4408_vm2, %v4409_v39  ;;  %3947 = vmatprep.mubr.msk.f32.mxu1 %vm4408_vm2, %v4409_v39 }
 0x524   :  { %4191 = vmatpush3.bf16.msra.mxu0 %v4814_v18  ;;  %4197 = vmatpush3.bf16.msra.mxu1 %v4816_v20 }
 0x525   :  { %4198 = vmatprep.subr.bf16.mxu0 %v4407_v19  ;;  %4204 = vmatprep.subr.bf16.mxu1 %v4407_v19 }
 0x527   :  { %3937 = vmatmul.mubr.msk.f32.vlgmr.msra.gmra.mrb[38].mxu0 %vm97_vm0, %v2289_v14  ;;  %3948 = vmatmul.mubr.msk.f32.vlgmr.msra.gmra.mrb[38].mxu1 %vm97_vm0, %v2289_v14 }
 0x528   :  { %4200 = vmatpush3.bf16.msra.mxu0 %v4782_v47  ;;  %4206 = vmatpush3.bf16.msra.mxu1 %v4784_v26 }
 0x529   :  { %4201 = vmatprep.subr.bf16.mxu0 %v4407_v19  ;;  %4207 = vmatprep.subr.bf16.mxu1 %v4407_v19 }
 0x52a   :  { %3958 = vmatprep.mubr.msk.f32.mxu0 %vm4408_vm2, %v4409_v39  ;;  %3969 = vmatprep.mubr.msk.f32.mxu1 %vm4408_vm2, %v4409_v39 }
 0x52c   :  { %4203 = vmatpush3.bf16.msra.mxu0 %v4790_v32  ;;  %4209 = vmatpush3.bf16.msra.mxu1 %v4792_v36 }
 0x52d   :  { %4210 = vmatprep.subr.bf16.mxu0 %v4407_v19  ;;  %4216 = vmatprep.subr.bf16.mxu1 %v4407_v19 }
 0x5f2   :  { %v2367_v22 = vpop.f32.mrb[36].mxu0  ;;  %v2444_v24 = vpop.f32.mrb[36].mxu1 }
 0x5f3   :  { %v2371_v41 = vadd.f32 %v2367_v22, %v2293_v21  ;;  %v2448_v42 = vadd.f32 %v2444_v24, %v2373_v23  ;;  %v3916_v25 = vpop.f32.mrb[37].mxu0  ;;  %v3927_v48 = vpop.f32.mrb[37].mxu1 }
 0x5f5   :  { %v2603_v29 = vmul.f32 0.5, %v2371_v41  ;;  %v2607_v30 = vmul.f32 0.5, %v2448_v42 }
 0x5f7   :  { %4302 = vtanh.f32 %v2603_v29 }
 0x5f8   :  { %4304 = vtanh.f32 %v2607_v30 }
 0x5fa   :  { %v2521_v35 = vpop.f32.mrb[38].mxu0  ;;  %v2598_v37 = vpop.f32.mrb[38].mxu1 }
 0x5fb   :  { %v2525_v38 = vadd.f32 %v2521_v35, %v2450_v31  ;;  %v3938_v43 = vpop.f32.mrb[39].mxu0  ;;  %v3949_v44 = vpop.f32.mrb[39].mxu1  ;;  %v2602_v45 = vadd.f32 %v2598_v37, %v2527_v40  ;;  %v3035_v31 = vld [vmem:[#allocation7 + $0x38] sm:$0xff] }
 0x5fd   :  { %4306 = vtanh.f32 %v2525_v38  ;;  %v2612_v46 = vmul.f32 0.5, %v2602_v45 }
 0x5ff   :  { %4308 = vtanh.f32 %v2612_v46  ;;  %v3189_v46 = vld [vmem:[#allocation9 + $0x38] sm:$0xff] }
 0x601   :  { %v4303_v49 = vpop.eup %4302 }
 0x602   :  { %v4305_v50 = vpop.eup %4304  ;;  %v2605_v51 = vmul.f32 0.5, %v4303_v49 }
 0x603   :  { %v2609_v52 = vmul.f32 0.5, %v4305_v50 }
 0x604   :  { %v2606_v53 = vadd.f32 0.5, %v2605_v51 }
 0x605   :  { %v2610_v54 = vadd.f32 0.5, %v2609_v52 }
 0x607   :  { %v4307_v55 = vpop.eup %4306  ;;  %v2616_v56 = vmul.f32 %v2610_v54, %v4799_v3 }
 0x608   :  { %v2617_v57 = vmul.f32 %v4307_v55, %v2606_v53 }
 0x609   :  { %v4309_v28 = vpop.eup %4308 }
 0x60a   :  { %v2618_v27 = vadd.f32 %v2617_v57, %v2616_v56  ;;  %v2614_v58 = vmul.f32 0.5, %v4309_v28 }
 0x60c   :  { %4310 = vtanh.f32 %v2618_v27  ;;  %v2615_v59 = vadd.f32 0.5, %v2614_v58 }
 0x616   :  { %v4311_v60 = vpop.eup %4310 }
 0x617   :  { %v2620_v61 = vmul.f32 %v4311_v60, %v2615_v59 }
 0x619   :  { %3409 = vst.msk [vmem:[%s4931_s6 + $0x28] sm:$0xff] %vm97_vm0, %v2620_v61  ;;  %3959 = vmatmul.mubr.msk.f32.vlgmr.msra.gmra.mrb[40].mxu0 %vm97_vm0, %v2620_v61  ;;  %3970 = vmatmul.mubr.msk.f32.vlgmr.msra.gmra.mrb[40].mxu1 %vm97_vm0, %v2620_v61 }
 0x61a   :  { %4212 = vmatpush3.bf16.msra.mxu0 %v4802_v11  ;;  %4218 = vmatpush3.bf16.msra.mxu1 %v4804_v12 }
 0x61b   :  { %4213 = vmatprep.subr.bf16.mxu0 %v4407_v19  ;;  %4219 = vmatprep.subr.bf16.mxu1 %v4407_v19 }
 0x61c   :  { %3980 = vmatprep.mubr.msk.f32.mxu0 %vm4408_vm2, %v4409_v39  ;;  %3991 = vmatprep.mubr.msk.f32.mxu1 %vm4408_vm2, %v4409_v39 }
 0x61e   :  { %4215 = vmatpush3.bf16.msra.mxu0 %v4814_v18  ;;  %4221 = vmatpush3.bf16.msra.mxu1 %v4816_v20 }
 0x61f   :  { %4222 = vmatprep.subr.bf16.mxu0 %v4407_v19  ;;  %4228 = vmatprep.subr.bf16.mxu1 %v4407_v19 }
 0x621   :  { %3981 = vmatmul.mubr.msk.f32.vlgmr.msra.gmra.mrb[42].mxu0 %vm97_vm0, %v2620_v61  ;;  %3992 = vmatmul.mubr.msk.f32.vlgmr.msra.gmra.mrb[42].mxu1 %vm97_vm0, %v2620_v61 }
 0x622   :  { %4224 = vmatpush3.bf16.msra.mxu0 %v4782_v47  ;;  %4230 = vmatpush3.bf16.msra.mxu1 %v4784_v26  ;;  %v2624_v47 = vld [vmem:[#allocation6 + $0x30] sm:$0xff] }
 0x623   :  { %4225 = vmatprep.subr.bf16.mxu0 %v4407_v19  ;;  %4231 = vmatprep.subr.bf16.mxu1 %v4407_v19 }
 0x624   :  { %4002 = vmatprep.mubr.msk.f32.mxu0 %vm4408_vm2, %v4409_v39  ;;  %4013 = vmatprep.mubr.msk.f32.mxu1 %vm4408_vm2, %v4409_v39 }
 0x626   :  { %4227 = vmatpush3.bf16.msra.mxu0 %v4790_v32  ;;  %4233 = vmatpush3.bf16.msra.mxu1 %v4792_v36 }
 0x627   :  { %4234 = vmatprep.subr.bf16.mxu0 %v4407_v19  ;;  %4240 = vmatprep.subr.bf16.mxu1 %v4407_v19 }
 0x6ec   :  { %v2698_v26 = vpop.f32.mrb[40].mxu0  ;;  %v2775_v63 = vpop.f32.mrb[40].mxu1 }
 0x6ed   :  { %v2702_v0 = vadd.f32 %v2698_v26, %v2624_v47  ;;  %v2779_v1 = vadd.f32 %v2775_v63, %v2704_v62  ;;  %v3960_v2 = vpop.f32.mrb[41].mxu0  ;;  %v3971_v33 = vpop.f32.mrb[41].mxu1 }
 0x6ef   :  { %v2934_v3 = vmul.f32 0.5, %v2702_v0  ;;  %v2938_v34 = vmul.f32 0.5, %v2779_v1 }
 0x6f1   :  { %4312 = vtanh.f32 %v2934_v3 }
 0x6f2   :  { %4314 = vtanh.f32 %v2938_v34 }
 0x6f4   :  { %v2852_v32 = vpop.f32.mrb[42].mxu0  ;;  %v2929_v5 = vpop.f32.mrb[42].mxu1 }
 0x6f5   :  { %v2856_v36 = vadd.f32 %v2852_v32, %v2781_v4  ;;  %v3982_v7 = vpop.f32.mrb[43].mxu0  ;;  %v3993_v8 = vpop.f32.mrb[43].mxu1  ;;  %v2933_v9 = vadd.f32 %v2929_v5, %v2858_v6 }
 0x6f7   :  { %4316 = vtanh.f32 %v2856_v36  ;;  %v2943_v10 = vmul.f32 0.5, %v2933_v9 }
 0x6f9   :  { %4318 = vtanh.f32 %v2943_v10 }
 0x6fb   :  { %v4313_v13 = vpop.eup %4312 }
 0x6fc   :  { %v4315_v14 = vpop.eup %4314  ;;  %v2936_v15 = vmul.f32 0.5, %v4313_v13 }
 0x6fd   :  { %v2940_v16 = vmul.f32 0.5, %v4315_v14 }
 0x6fe   :  { %v2937_v17 = vadd.f32 0.5, %v2936_v15 }
 0x6ff   :  { %v2941_v21 = vadd.f32 0.5, %v2940_v16 }
 0x701   :  { %v4317_v22 = vpop.eup %4316  ;;  %v2947_v23 = vmul.f32 %v2941_v21, %v2618_v27 }
 0x702   :  { %v2948_v24 = vmul.f32 %v4317_v22, %v2937_v17 }
 0x703   :  { %v4319_v42 = vpop.eup %4318 }
 0x704   :  { %v2949_v41 = vadd.f32 %v2948_v24, %v2947_v23  ;;  %v2945_v25 = vmul.f32 0.5, %v4319_v42 }
 0x706   :  { %4320 = vtanh.f32 %v2949_v41  ;;  %v2946_v48 = vadd.f32 0.5, %v2945_v25 }
 0x710   :  { %v4321_v29 = vpop.eup %4320 }
 0x711   :  { %v2951_v30 = vmul.f32 %v4321_v29, %v2946_v48 }
 0x713   :  { %3414 = vst.msk [vmem:[%s4931_s6 + $0x30] sm:$0xff] %vm97_vm0, %v2951_v30  ;;  %4003 = vmatmul.mubr.msk.f32.vlgmr.msra.gmra.mrb[44].mxu0 %vm97_vm0, %v2951_v30  ;;  %4014 = vmatmul.mubr.msk.f32.vlgmr.msra.gmra.mrb[44].mxu1 %vm97_vm0, %v2951_v30 }
 0x714   :  { %4236 = vmatpush3.bf16.msra.mxu0 %v4802_v11  ;;  %4242 = vmatpush3.bf16.msra.mxu1 %v4804_v12  ;;  %v2955_v11 = vld [vmem:[#allocation6 + $0x38] sm:$0xff] }
 0x715   :  { %4237 = vmatprep.subr.bf16.mxu0 %v4407_v19  ;;  %4243 = vmatprep.subr.bf16.mxu1 %v4407_v19 }
 0x716   :  { %4024 = vmatprep.mubr.msk.f32.mxu0 %vm4408_vm2, %v4409_v39  ;;  %4035 = vmatprep.mubr.msk.f32.mxu1 %vm4408_vm2, %v4409_v39  ;;  %v3112_v39 = vld [vmem:[#allocation8 + $0x38] sm:$0xff] }
 0x718   :  { %4239 = vmatpush3.bf16.msra.mxu0 %v4814_v18  ;;  %4245 = vmatpush3.bf16.msra.mxu1 %v4816_v20 }
 0x71b   :  { %4025 = vmatmul.mubr.msk.f32.vlgmr.msra.gmra.mrb[46].mxu0 %vm97_vm0, %v2951_v30  ;;  %4036 = vmatmul.mubr.msk.f32.vlgmr.msra.gmra.mrb[46].mxu1 %vm97_vm0, %v2951_v30 }
 0x7e6   :  { %v3029_v12 = vpop.f32.mrb[44].mxu0  ;;  %v3106_v35 = vpop.f32.mrb[44].mxu1 }
 0x7e7   :  { %v3033_v37 = vadd.f32 %v3029_v12, %v2955_v11  ;;  %v3110_v19 = vadd.f32 %v3106_v35, %v3035_v31  ;;  %v4004_v38 = vpop.f32.mrb[45].mxu0  ;;  %v4015_v40 = vpop.f32.mrb[45].mxu1 }
 0x7e9   :  { %v3265_v43 = vmul.f32 0.5, %v3033_v37  ;;  %v3269_v44 = vmul.f32 0.5, %v3110_v19 }
 0x7eb   :  { %4322 = vtanh.f32 %v3265_v43 }
 0x7ec   :  { %4324 = vtanh.f32 %v3269_v44 }
 0x7ee   :  { %v3183_v18 = vpop.f32.mrb[46].mxu0  ;;  %v3260_v45 = vpop.f32.mrb[46].mxu1 }
 0x7ef   :  { %v3187_v20 = vadd.f32 %v3183_v18, %v3112_v39  ;;  %v4026_v49 = vpop.f32.mrb[47].mxu0  ;;  %v4037_v50 = vpop.f32.mrb[47].mxu1  ;;  %v3264_v51 = vadd.f32 %v3260_v45, %v3189_v46 }
 0x7f1   :  { %4326 = vtanh.f32 %v3187_v20  ;;  %v3274_v52 = vmul.f32 0.5, %v3264_v51 }
 0x7f3   :  { %4328 = vtanh.f32 %v3274_v52 }
 0x7f5   :  { %v4323_v53 = vpop.eup %4322 }
 0x7f6   :  { %v4325_v54 = vpop.eup %4324  ;;  %v3267_v55 = vmul.f32 0.5, %v4323_v53 }
 0x7f7   :  { %v3271_v56 = vmul.f32 0.5, %v4325_v54 }
 0x7f8   :  { %v3268_v57 = vadd.f32 0.5, %v3267_v55 }
 0x7f9   :  { %v3272_v27 = vadd.f32 0.5, %v3271_v56 }
 0x7fb   :  { %v4327_v28 = vpop.eup %4326  ;;  %v3278_v58 = vmul.f32 %v3272_v27, %v2949_v41 }
 0x7fc   :  { %v3279_v59 = vmul.f32 %v4327_v28, %v3268_v57 }
 0x7fe   :  { %v3280_v60 = vadd.f32 %v3279_v59, %v3278_v58 }
 0x800   :  { %3286 = vst.msk [vmem:[#allocation3] sm:$0xff] %vm97_vm0, %v3280_v60  ;;  %3288 = vst.msk [vmem:[#allocation13] sm:$0xff] %vm97_vm0, %v3280_v60  ;;  %4330 = vtanh.f32 %v3280_v60 }
 0x801   :  { %4365 = shalt.err (!%p4362_p12)
}
 0x802   :  { %s4366_s26 = scalar_lea.hbm %s4933_s8, 128 }
 0x803   :  { %p4367_p13 = scmp.ne.s32.totalorder %s4933_s8, %s4366_s26  ;;  %p4370_p0 = scmp.lt.u32.totalorder %s4366_s26, %s4933_s8 }
 0x805   :  { %p4372_p1 = pnand %p4370_p0, %p4367_p13 }
 0x807   :  { %4375 = shalt.err (!%p4372_p1)
}
 0x808   :  { %3310 = dma.vmem_to_hbm [thread:$0]  %s3308_s22, 128, %s4933_s8, [#allocation14]   ;;  %v4329_v61 = vpop.eup %4328 }
 0x809   :  { %v3276_v47 = vmul.f32 0.5, %v4329_v61  ;;  %s4411_s1 = smov [#allocation11]  }
 0x80a   :  { %s3297_s9 = sshll.u32 %s4411_s1, 4  ;;  %v4331_v62 = vpop.eup %4330  ;;  %s3298_s9 = int_to_ptr.vmem [resolvable:$true] %s3297_s9 }
 0x80b   :  { %v3277_v26 = vadd.f32 0.5, %v3276_v47  ;;  %s4376_s10 = scalar_lea.vmem %s3298_s9, 128  ;;  %p4381_p3 = scmp.lt.s32.totalorder %s3298_s9, %s3298_s9 }
 0x80c   :  { %p4377_p2 = scmp.ne.s32.totalorder %s3298_s9, %s4376_s10  ;;  %p4382_p4 = scmp.lt.s32.totalorder %s4376_s10, %s4376_s10 }
 0x80d   :  { %v3282_v63 = vmul.f32 %v4331_v62, %v3277_v26 }
 0x80e   :  { %p4383_p5 = por %p4382_p4, %p4381_p3 }
 0x80f   :  { %3419 = vst.msk [vmem:[%s4931_s6 + $0x38] sm:$0xff] %vm97_vm0, %v3282_v63  ;;  %3285 = vst.msk [vmem:[#allocation2] sm:$0xff] %vm97_vm0, %v3282_v63 }
 0x810   :  { %3287 = vst.msk [vmem:[#allocation11] sm:$0xff] %vm97_vm0, %v3282_v63  ;;  %p4384_p6 = pnand %p4383_p5, %p4377_p2 }
 0x812   :  { %4387 = shalt.err (!%p4384_p6)
}
 0x813   :  { %s4388_s12 = scalar_lea.hbm %s4932_s7, 128 }
 0x814   :  { %p4389_p7 = scmp.ne.s32.totalorder %s4932_s7, %s4388_s12  ;;  %p4392_p8 = scmp.lt.u32.totalorder %s4388_s12, %s4932_s7 }
 0x816   :  { %p4394_p9 = pnand %p4392_p8, %p4389_p7 }
 0x818   :  { %4397 = shalt.err (!%p4394_p9)
}
 0x819   :  { %3300 = dma.vmem_to_hbm [thread:$0]  %s3298_s9, 128, %s4932_s7, [#allocation12]  }
 0x81a   :  { %4402 = dma.done.wait [#allocation12], 128  }
 0x81b   :  { %4403 = vsyncadd [#allocation12], 4294967168 }
 0x81c   :  { %4404 = dma.done.wait [#allocation14], 128  }
 0x81d   :  { %4405 = vsyncadd [#allocation14], 4294967168 }
 0x81e   :  { %3319 = vsyncpa [#allocation12], 1 }
 0x81f   :  { %3320 = vsyncpa [#allocation14], 1 }
 0x820   :  { %3321 = vsyncmov [#allocation10] }
 0x823   :  { %s3322_s17 = vpop.sfrf %3321 }
 0x824   :  { %p3420_p10 = scmp.ne.s32.totalorder %s3322_s17, 0 }
 0x826   :  { %3326 = shalt.err (%p3420_p10)  }
 0x827   :  { %3328 = vsyncmov [#allocation10 + $0x1] }
 0x82a   :  { %s3329_s18 = vpop.sfrf %3328 }
 0x82b   :  { %p3421_p11 = scmp.ne.s32.totalorder %s3329_s18, 0 }
 0x82d   :  { %3333 = shalt.err (%p3421_p11)  }

</bundles_post_ra>
